<compile_context>
chip_gen: v7x
topology: tpu7x:2x2x1
jax: 0.10.0
libtpu: 0.0.40
codegen_flags: <defaults>
</compile_context>

<pallas_src>
import math

import jax
import jax.numpy as jnp
from jax.experimental import pallas as pl
from jax.experimental.pallas import tpu as pltpu


# ----------------------------- model config --------------------------------
EMBED_DIM = 128          # d_model (small lane-aligned stand-in for 512)
NUM_HEADS = 8
HEAD_DIM = EMBED_DIM // NUM_HEADS
DIM_FF = EMBED_DIM       # dim_feedforward == embedding_dim in the module
LN_EPS = 1e-5
BATCH = 2
SEQ = 8                  # V


def _layer_norm(x, gamma, beta, eps=LN_EPS):
    mu = jnp.mean(x, axis=-1, keepdims=True)
    var = jnp.mean((x - mu) ** 2, axis=-1, keepdims=True)
    return (x - mu) * jax.lax.rsqrt(var + eps) * gamma + beta


def _encoder_reducer_kernel(
    # inputs
    x_ref,          # (SB, V, D)  f32 activations
    wqkv_ref,       # (D, 3D)     bf16  fused QKV weight (1/sqrt(hd) folded into Q cols)
    bqkv_ref,       # (1, 3D)     f32   fused QKV bias   (1/sqrt(hd) folded into Q part)
    hmask_ref,      # (D, D)      bf16  block-diagonal head mask (1 iff same head)
    wo_ref,         # (D, D)      bf16  attention output projection
    w1_ref,         # (D, Dff)    bf16  FFN linear1
    w2_ref,         # (Dff, D)    bf16  FFN linear2
    wl_ref,         # (D, D)      bf16  final Linear (1/V folded in)
    vec_ref,        # (8, D)      f32   rows: b_o, g1, be1, b1, b2, g2, be2, b_l
    # output
    out_ref,        # (SB, D)     f32
):
    sb, seq, d = x_ref.shape
    rows = sb * seq
    f32, bf16 = jnp.float32, jnp.bfloat16

    vecs = vec_ref[...]
    b_o, g1, be1, b1, b2, g2, be2, b_l = (vecs[i:i + 1, :] for i in range(8))

    # (SB, V, D) -> (SB*V, D): sublane-only merge, no relayout.
    x = x_ref[...].reshape(rows, d)

    # ----- fused QKV projection: one (rows, D) x (D, 3D) bf16 matmul -----
    qkv = jnp.dot(x.astype(bf16), wqkv_ref[...],
                  preferred_element_type=f32) + bqkv_ref[...]
    q3 = qkv[:, :d].reshape(sb, seq, d)            # 1/sqrt(hd) already folded in
    k3 = qkv[:, d:2 * d].reshape(sb, seq, d)
    v3 = qkv[:, 2 * d:].reshape(sb, seq, d)

    # ----- attention: lane-dense, zero head transposes -----
    # Outer product over (query, key) token pairs; lanes stay the feature axis.
    prod = q3[:, :, None, :] * k3[:, None, :, :]               # (SB, V, V, D)
    # Segment-sum each head's hd lanes (and broadcast back across the head's
    # lanes) with one matmul against the constant block-diagonal head mask.
    raw = jnp.dot(prod.reshape(rows * seq, d).astype(bf16), hmask_ref[...],
                  preferred_element_type=f32).reshape(sb, seq, seq, d)
    # Per-head softmax over the key axis (axis=2); scores are replicated across
    # each head's lanes so every lane is live (no lane-sparse max/exp/sum).
    m = jnp.max(raw, axis=2, keepdims=True)                    # (SB, V, 1, D)
    p = jnp.exp(raw - m)                                       # (SB, V, V, D)
    denom = jnp.sum(p, axis=2)                                 # (SB, V, D)
    ctx = jnp.sum(p * v3[:, None, :, :], axis=2)               # (SB, V, D)  (p @ v on VPU)
    attn = (ctx / denom).reshape(rows, d)                      # exact softmax normalize

    attn = jnp.dot(attn.astype(bf16), wo_ref[...],
                   preferred_element_type=f32) + b_o

    # ----- residual + LayerNorm 1 (f32) -----
    y = _layer_norm(x + attn, g1, be1)

    # ----- feed-forward (relu) -----
    h1 = jnp.dot(y.astype(bf16), w1_ref[...], preferred_element_type=f32) + b1
    h1 = jnp.maximum(h1, 0.0)
    ffn = jnp.dot(h1.astype(bf16), w2_ref[...], preferred_element_type=f32) + b2

    # ----- residual + LayerNorm 2 (f32) -----
    z = _layer_norm(y + ffn, g2, be2)

    # ----- pool over sequence (1/V folded into wl) + final Linear -----
    pooled = jnp.sum(z.reshape(sb, seq, d), axis=1)            # (SB, D)
    emb = jnp.dot(pooled.astype(bf16), wl_ref[...],
                  preferred_element_type=f32) + b_l

    out_ref[...] = emb.astype(out_ref.dtype)                   # lane-dense (SB, D) store


def init_params(key, d=EMBED_DIM, dff=DIM_FF):
    """Deterministic synthetic parameters mirroring the nn.Module shapes."""
    ks = jax.random.split(key, 12)
    std = 0.02
    p = {}
    # nn.MultiheadAttention: in_proj_weight (3D, D), in_proj_bias (3D,)
    p["in_proj_w"] = std * jax.random.normal(ks[0], (3 * d, d), jnp.float32)
    p["in_proj_b"] = std * jax.random.normal(ks[1], (3 * d,), jnp.float32)
    p["out_proj_w"] = std * jax.random.normal(ks[2], (d, d), jnp.float32)
    p["out_proj_b"] = std * jax.random.normal(ks[3], (d,), jnp.float32)
    # LayerNorms
    p["ln1_g"] = jnp.ones((d,), jnp.float32)
    p["ln1_b"] = jnp.zeros((d,), jnp.float32)
    p["ln2_g"] = jnp.ones((d,), jnp.float32)
    p["ln2_b"] = jnp.zeros((d,), jnp.float32)
    # FFN
    p["lin1_w"] = std * jax.random.normal(ks[4], (dff, d), jnp.float32)
    p["lin1_b"] = std * jax.random.normal(ks[5], (dff,), jnp.float32)
    p["lin2_w"] = std * jax.random.normal(ks[6], (d, dff), jnp.float32)
    p["lin2_b"] = std * jax.random.normal(ks[7], (d,), jnp.float32)
    # Final Linear
    p["out_w"] = std * jax.random.normal(ks[8], (d, d), jnp.float32)
    p["out_b"] = std * jax.random.normal(ks[9], (d,), jnp.float32)
    return p


def prepare_params(params, *, num_heads=NUM_HEADS, seq_len=SEQ):
    """One-time (hoisted) preprocessing into kernel layout.

    - Weights transposed to (in, out) and cast to bf16 (f32 accumulation in the
      kernel); bf16-level drift vs f32 torch is accepted and documented.
    - 1/sqrt(head_dim) folded into the Q columns of w_qkv / b_qkv.
    - 1/seq_len folded into the final Linear weight (kernel pools with a sum),
      so the prepared params are tied to this sequence length.
    - Bias / gamma / beta rows packed into a single (8, D) f32 slab.
    - Constant block-diagonal head mask built once (encodes the head split, so
      the kernel never transposes / reshapes heads).
    """
    d = params["out_proj_w"].shape[0]
    dff = params["lin1_w"].shape[0]
    assert dff == d, "module fixes dim_feedforward == embedding_dim"
    assert d % num_heads == 0
    hd = d // num_heads
    scale = 1.0 / math.sqrt(hd)

    wq, wk, wv = jnp.split(params["in_proj_w"], 3, axis=0)           # (D, D) each
    bq, bk, bv = jnp.split(params["in_proj_b"], 3)
    w_qkv = jnp.concatenate([wq.T * scale, wk.T, wv.T], axis=1)      # (D, 3D)
    b_qkv = jnp.concatenate([bq * scale, bk, bv]).reshape(1, 3 * d)  # (1, 3D)

    head_id = jnp.arange(d) // hd
    hmask = (head_id[:, None] == head_id[None, :]).astype(jnp.bfloat16)  # (D, D)

    vecs = jnp.stack([
        params["out_proj_b"],
        params["ln1_g"], params["ln1_b"],
        params["lin1_b"],
        params["lin2_b"],
        params["ln2_g"], params["ln2_b"],
        params["out_b"],
    ], axis=0).astype(jnp.float32)                                    # (8, D)

    kp = {
        "w_qkv": w_qkv.astype(jnp.bfloat16),
        "b_qkv": b_qkv.astype(jnp.float32),
        "hmask": hmask,
        "w_o": params["out_proj_w"].T.astype(jnp.bfloat16),
        "w1": params["lin1_w"].T.astype(jnp.bfloat16),
        "w2": params["lin2_w"].T.astype(jnp.bfloat16),
        "w_l": (params["out_w"].T / float(seq_len)).astype(jnp.bfloat16),
        "vecs": vecs,
    }
    kp = jax.tree_util.tree_map(jnp.asarray, kp)   # materialize once, outside per-call path
    kp["_seq_len"] = int(seq_len)                  # guard: 1/V fold is tied to this length
    return kp


def _default_seqs_per_step(batch, seq, target_rows=256):
    """Smallest divisor of `batch` whose block still has >= target_rows rows
    (MXU row occupancy on v6e/v7x); falls back to the whole batch. For large B
    this yields >= 2 grid steps automatically (activation-DMA pipelining and
    both v7x TensorCores via the 'parallel' grid axis). On v5e, 128 rows is
    enough — pass seqs_per_step explicitly if tuning per generation."""
    for sb in range(1, batch + 1):
        if batch % sb == 0 and sb * seq >= target_rows:
            return sb
    return batch


def transformer_embedding_reducer(x, kparams, *, seqs_per_step=None):
    """x: (B, V, D) float32, kparams from prepare_params -> (B, D) float32."""
    B, V, D = x.shape
    dff = kparams["w1"].shape[1]
    assert kparams["_seq_len"] == V, (
        "prepare_params folded 1/V for a different sequence length")
    sb = _default_seqs_per_step(B, V) if seqs_per_step is None else seqs_per_step
    assert B % sb == 0, "seqs_per_step must divide B"
    steps = B // sb

    weight_args = (
        kparams["w_qkv"], kparams["b_qkv"], kparams["hmask"], kparams["w_o"],
        kparams["w1"], kparams["w2"], kparams["w_l"], kparams["vecs"],
    )

    def const_spec(a):
        nd = a.ndim
        return pl.BlockSpec(a.shape, lambda b, _nd=nd: (0,) * _nd)

    in_specs = [pl.BlockSpec((sb, V, D), lambda b: (b, 0, 0))] + [
        const_spec(a) for a in weight_args
    ]

    # Advisory cost estimate (helps XLA schedule around the custom call).
    flops = (
        2 * B * V * D * (3 * D)          # fused QKV projection
        + 2 * B * V * V * D * D          # head-mask segment-sum matmul (scores)
        + 3 * B * V * V * D              # VPU outer product + p@v + reduce
        + 2 * B * V * D * D              # attention output projection
        + 2 * 2 * B * V * D * dff        # FFN
        + 2 * B * D * D                  # final Linear
    )
    transcendentals = B * V * V * D      # lane-replicated softmax exp
    bytes_accessed = int(
        x.size * x.dtype.itemsize
        + sum(int(a.size) * a.dtype.itemsize for a in weight_args)
        + B * D * 4
    )

    out = pl.pallas_call(
        _encoder_reducer_kernel,
        out_shape=jax.ShapeDtypeStruct((B, D), jnp.float32),
        grid_spec=pltpu.PrefetchScalarGridSpec(
            num_scalar_prefetch=0,
            grid=(steps,),
            in_specs=in_specs,
            out_specs=pl.BlockSpec((sb, D), lambda b: (b, 0)),
        ),
        compiler_params=pltpu.CompilerParams(
            dimension_semantics=("parallel",),
            # NOTE: working set (<1 MB at D=128) is far below every chip's
            # scoped-VMEM default. When scaling D / seqs_per_step, re-derive the
            # budget against v7x's 64 MiB physical (32 MiB default scoped):
            # 2x the (sb,V,D) x block + resident bf16 weights + compiler temps
            # for qkv/h1/scores, and set vmem_limit_bytes explicitly.
        ),
        cost_estimate=pl.CostEstimate(
            flops=flops,
            transcendentals=transcendentals,
            bytes_accessed=bytes_accessed,
        ),
    )(x, *weight_args)
    return out


if __name__ == "__main__":
    key = jax.random.PRNGKey(0)
    k_x, k_p = jax.random.split(key)
    x = jax.random.normal(k_x, (BATCH, SEQ, EMBED_DIM), jnp.float32)
    params = init_params(k_p)
    kparams = prepare_params(params, num_heads=NUM_HEADS, seq_len=SEQ)
    jax.block_until_ready([v for k, v in kparams.items() if k != "_seq_len"])

    emb = transformer_embedding_reducer(x, kparams)
    jax.block_until_ready(emb)
    assert emb.shape == (BATCH, EMBED_DIM), emb.shape
    assert bool(jnp.all(jnp.isfinite(emb)))
    print("KERNEL_OK")
</pallas_src>

<mosaic_0001>
module attributes {stable_mosaic.version = 11 : i64} {
  func.func @_encoder_reducer_kernel(%arg0: i32, %arg1: memref<2x8x128xf32, #tpu.memory_space<vmem>>, %arg2: memref<128x384xbf16, #tpu.memory_space<vmem>>, %arg3: memref<1x384xf32, #tpu.memory_space<vmem>>, %arg4: memref<128x128xbf16, #tpu.memory_space<vmem>>, %arg5: memref<128x128xbf16, #tpu.memory_space<vmem>>, %arg6: memref<128x128xbf16, #tpu.memory_space<vmem>>, %arg7: memref<128x128xbf16, #tpu.memory_space<vmem>>, %arg8: memref<128x128xbf16, #tpu.memory_space<vmem>>, %arg9: memref<8x128xf32, #tpu.memory_space<vmem>>, %arg10: memref<2x128xf32, #tpu.memory_space<vmem>>) attributes {dimension_semantics = [#tpu.dimension_semantics<parallel>], iteration_bounds = array<i64: 1>, scalar_prefetch = 0 : i64, scratch_operands = 0 : i64, tpu.core_type = #tpu.core_type<tc>, window_params = [{transform_indices = @transform_0, window_bounds = array<i64: 2, 8, 128>}, {pipeline_mode = #tpu.pipeline_mode<synchronous>, transform_indices = @transform_1, window_bounds = array<i64: 128, 384>}, {pipeline_mode = #tpu.pipeline_mode<synchronous>, transform_indices = @transform_2, window_bounds = array<i64: 1, 384>}, {pipeline_mode = #tpu.pipeline_mode<synchronous>, transform_indices = @transform_3, window_bounds = array<i64: 128, 128>}, {pipeline_mode = #tpu.pipeline_mode<synchronous>, transform_indices = @transform_4, window_bounds = array<i64: 128, 128>}, {pipeline_mode = #tpu.pipeline_mode<synchronous>, transform_indices = @transform_5, window_bounds = array<i64: 128, 128>}, {pipeline_mode = #tpu.pipeline_mode<synchronous>, transform_indices = @transform_6, window_bounds = array<i64: 128, 128>}, {pipeline_mode = #tpu.pipeline_mode<synchronous>, transform_indices = @transform_7, window_bounds = array<i64: 128, 128>}, {pipeline_mode = #tpu.pipeline_mode<synchronous>, transform_indices = @transform_8, window_bounds = array<i64: 8, 128>}, {transform_indices = @transform_9, window_bounds = array<i64: 2, 128>}]} {
    %c0 = arith.constant 0 : index
    %c0_0 = arith.constant 0 : index
    %0 = vector.load %arg9[%c0, %c0_0] : memref<8x128xf32, #tpu.memory_space<vmem>>, vector<8x128xf32>
    %1 = vector.extract_strided_slice %0 {offsets = [0, 0], sizes = [1, 128], strides = [1, 1]} : vector<8x128xf32> to vector<1x128xf32>
    %2 = vector.extract_strided_slice %0 {offsets = [1, 0], sizes = [1, 128], strides = [1, 1]} : vector<8x128xf32> to vector<1x128xf32>
    %3 = vector.extract_strided_slice %0 {offsets = [2, 0], sizes = [1, 128], strides = [1, 1]} : vector<8x128xf32> to vector<1x128xf32>
    %4 = vector.extract_strided_slice %0 {offsets = [3, 0], sizes = [1, 128], strides = [1, 1]} : vector<8x128xf32> to vector<1x128xf32>
    %5 = vector.extract_strided_slice %0 {offsets = [4, 0], sizes = [1, 128], strides = [1, 1]} : vector<8x128xf32> to vector<1x128xf32>
    %6 = vector.extract_strided_slice %0 {offsets = [5, 0], sizes = [1, 128], strides = [1, 1]} : vector<8x128xf32> to vector<1x128xf32>
    %7 = vector.extract_strided_slice %0 {offsets = [6, 0], sizes = [1, 128], strides = [1, 1]} : vector<8x128xf32> to vector<1x128xf32>
    %8 = vector.extract_strided_slice %0 {offsets = [7, 0], sizes = [1, 128], strides = [1, 1]} : vector<8x128xf32> to vector<1x128xf32>
    %c0_1 = arith.constant 0 : index
    %c0_2 = arith.constant 0 : index
    %c0_3 = arith.constant 0 : index
    %9 = vector.load %arg1[%c0_1, %c0_2, %c0_3] : memref<2x8x128xf32, #tpu.memory_space<vmem>>, vector<2x8x128xf32>
    %10 = vector.shape_cast %9 : vector<2x8x128xf32> to vector<16x128xf32>
    %11 = arith.truncf %10 : vector<16x128xf32> to vector<16x128xbf16>
    %c0_4 = arith.constant 0 : index
    %c0_5 = arith.constant 0 : index
    %12 = vector.load %arg2[%c0_4, %c0_5] : memref<128x384xbf16, #tpu.memory_space<vmem>>, vector<128x384xbf16>
    %cst = arith.constant dense<0.000000e+00> : vector<16x384xf32>
    %13 = tpu.matmul %11, %12, %cst {dimension_numbers = #tpu.dot_dimension_numbers<[1], [0], [0], [1], [0, 0, 1, 1], [], []>} : vector<16x128xbf16>, vector<128x384xbf16>, vector<16x384xf32> -> vector<16x384xf32>
    %c0_6 = arith.constant 0 : index
    %c0_7 = arith.constant 0 : index
    %14 = vector.load %arg3[%c0_6, %c0_7] : memref<1x384xf32, #tpu.memory_space<vmem>>, vector<1x384xf32>
    %15 = vector.broadcast %14 : vector<1x384xf32> to vector<16x384xf32>
    %16 = arith.addf %13, %15 : vector<16x384xf32>
    %17 = vector.extract_strided_slice %16 {offsets = [0, 0], sizes = [16, 128], strides = [1, 1]} : vector<16x384xf32> to vector<16x128xf32>
    %18 = vector.shape_cast %17 : vector<16x128xf32> to vector<2x8x128xf32>
    %19 = vector.extract_strided_slice %16 {offsets = [0, 128], sizes = [16, 128], strides = [1, 1]} : vector<16x384xf32> to vector<16x128xf32>
    %20 = vector.shape_cast %19 : vector<16x128xf32> to vector<2x8x128xf32>
    %21 = vector.extract_strided_slice %16 {offsets = [0, 256], sizes = [16, 128], strides = [1, 1]} : vector<16x384xf32> to vector<16x128xf32>
    %22 = vector.shape_cast %21 : vector<16x128xf32> to vector<2x8x128xf32>
    %23 = vector.shape_cast %18 : vector<2x8x128xf32> to vector<2x8x1x128xf32>
    %24 = vector.shape_cast %20 : vector<2x8x128xf32> to vector<2x1x8x128xf32>
    %25 = vector.broadcast %23 : vector<2x8x1x128xf32> to vector<2x8x8x128xf32>
    %26 = vector.broadcast %24 : vector<2x1x8x128xf32> to vector<2x8x8x128xf32>
    %27 = arith.mulf %25, %26 : vector<2x8x8x128xf32>
    %28 = vector.shape_cast %27 : vector<2x8x8x128xf32> to vector<128x128xf32>
    %29 = arith.truncf %28 : vector<128x128xf32> to vector<128x128xbf16>
    %c0_8 = arith.constant 0 : index
    %c0_9 = arith.constant 0 : index
    %30 = vector.load %arg4[%c0_8, %c0_9] : memref<128x128xbf16, #tpu.memory_space<vmem>>, vector<128x128xbf16>
    %cst_10 = arith.constant dense<0.000000e+00> : vector<128x128xf32>
    %31 = tpu.matmul %29, %30, %cst_10 {dimension_numbers = #tpu.dot_dimension_numbers<[1], [0], [0], [1], [0, 0, 1, 1], [], []>} : vector<128x128xbf16>, vector<128x128xbf16>, vector<128x128xf32> -> vector<128x128xf32>
    %32 = vector.shape_cast %31 : vector<128x128xf32> to vector<2x8x8x128xf32>
    %cst_11 = arith.constant dense<0xFF800000> : vector<2x8x128xf32>
    %33 = vector.multi_reduction <maximumf>, %32, %cst_11 [2] : vector<2x8x8x128xf32> to vector<2x8x128xf32>
    %34 = vector.shape_cast %33 : vector<2x8x128xf32> to vector<2x8x1x128xf32>
    %35 = vector.broadcast %34 : vector<2x8x1x128xf32> to vector<2x8x8x128xf32>
    %36 = arith.subf %32, %35 : vector<2x8x8x128xf32>
    %37 = math.exp %36 : vector<2x8x8x128xf32>
    %cst_12 = arith.constant dense<0.000000e+00> : vector<2x8x128xf32>
    %38 = vector.multi_reduction <add>, %37, %cst_12 [2] : vector<2x8x8x128xf32> to vector<2x8x128xf32>
    %39 = vector.shape_cast %22 : vector<2x8x128xf32> to vector<2x1x8x128xf32>
    %40 = vector.broadcast %39 : vector<2x1x8x128xf32> to vector<2x8x8x128xf32>
    %41 = arith.mulf %37, %40 : vector<2x8x8x128xf32>
    %cst_13 = arith.constant dense<0.000000e+00> : vector<2x8x128xf32>
    %42 = vector.multi_reduction <add>, %41, %cst_13 [2] : vector<2x8x8x128xf32> to vector<2x8x128xf32>
    %43 = arith.divf %42, %38 : vector<2x8x128xf32>
    %44 = vector.shape_cast %43 : vector<2x8x128xf32> to vector<16x128xf32>
    %45 = arith.truncf %44 : vector<16x128xf32> to vector<16x128xbf16>
    %c0_14 = arith.constant 0 : index
    %c0_15 = arith.constant 0 : index
    %46 = vector.load %arg5[%c0_14, %c0_15] : memref<128x128xbf16, #tpu.memory_space<vmem>>, vector<128x128xbf16>
    %cst_16 = arith.constant dense<0.000000e+00> : vector<16x128xf32>
    %47 = tpu.matmul %45, %46, %cst_16 {dimension_numbers = #tpu.dot_dimension_numbers<[1], [0], [0], [1], [0, 0, 1, 1], [], []>} : vector<16x128xbf16>, vector<128x128xbf16>, vector<16x128xf32> -> vector<16x128xf32>
    %48 = vector.broadcast %1 : vector<1x128xf32> to vector<16x128xf32>
    %49 = arith.addf %47, %48 : vector<16x128xf32>
    %50 = arith.addf %10, %49 : vector<16x128xf32>
    %cst_17 = arith.constant dense<0.000000e+00> : vector<16xf32>
    %51 = vector.multi_reduction <add>, %50, %cst_17 [1] : vector<16x128xf32> to vector<16xf32>
    %52 = vector.shape_cast %51 : vector<16xf32> to vector<16x1xf32>
    %cst_18 = arith.constant 1.280000e+02 : f32
    %53 = vector.broadcast %cst_18 : f32 to vector<16x1xf32>
    %54 = arith.divf %52, %53 : vector<16x1xf32>
    %55 = vector.broadcast %54 : vector<16x1xf32> to vector<16x128xf32>
    %56 = arith.subf %50, %55 : vector<16x128xf32>
    %57 = arith.mulf %56, %56 : vector<16x128xf32>
    %cst_19 = arith.constant dense<0.000000e+00> : vector<16xf32>
    %58 = vector.multi_reduction <add>, %57, %cst_19 [1] : vector<16x128xf32> to vector<16xf32>
    %59 = vector.shape_cast %58 : vector<16xf32> to vector<16x1xf32>
    %cst_20 = arith.constant 1.280000e+02 : f32
    %60 = vector.broadcast %cst_20 : f32 to vector<16x1xf32>
    %61 = arith.divf %59, %60 : vector<16x1xf32>
    %62 = vector.broadcast %54 : vector<16x1xf32> to vector<16x128xf32>
    %63 = arith.subf %50, %62 : vector<16x128xf32>
    %cst_21 = arith.constant 9.99999974E-6 : f32
    %64 = vector.broadcast %cst_21 : f32 to vector<16x1xf32>
    %65 = arith.addf %61, %64 : vector<16x1xf32>
    %66 = math.rsqrt %65 : vector<16x1xf32>
    %67 = vector.broadcast %66 : vector<16x1xf32> to vector<16x128xf32>
    %68 = arith.mulf %63, %67 : vector<16x128xf32>
    %69 = vector.broadcast %2 : vector<1x128xf32> to vector<16x128xf32>
    %70 = arith.mulf %68, %69 : vector<16x128xf32>
    %71 = vector.broadcast %3 : vector<1x128xf32> to vector<16x128xf32>
    %72 = arith.addf %70, %71 : vector<16x128xf32>
    %73 = arith.truncf %72 : vector<16x128xf32> to vector<16x128xbf16>
    %c0_22 = arith.constant 0 : index
    %c0_23 = arith.constant 0 : index
    %74 = vector.load %arg6[%c0_22, %c0_23] : memref<128x128xbf16, #tpu.memory_space<vmem>>, vector<128x128xbf16>
    %cst_24 = arith.constant dense<0.000000e+00> : vector<16x128xf32>
    %75 = tpu.matmul %73, %74, %cst_24 {dimension_numbers = #tpu.dot_dimension_numbers<[1], [0], [0], [1], [0, 0, 1, 1], [], []>} : vector<16x128xbf16>, vector<128x128xbf16>, vector<16x128xf32> -> vector<16x128xf32>
    %76 = vector.broadcast %4 : vector<1x128xf32> to vector<16x128xf32>
    %77 = arith.addf %75, %76 : vector<16x128xf32>
    %cst_25 = arith.constant 0.000000e+00 : f32
    %78 = vector.broadcast %cst_25 : f32 to vector<16x128xf32>
    %79 = arith.maximumf %77, %78 : vector<16x128xf32>
    %80 = arith.truncf %79 : vector<16x128xf32> to vector<16x128xbf16>
    %c0_26 = arith.constant 0 : index
    %c0_27 = arith.constant 0 : index
    %81 = vector.load %arg7[%c0_26, %c0_27] : memref<128x128xbf16, #tpu.memory_space<vmem>>, vector<128x128xbf16>
    %cst_28 = arith.constant dense<0.000000e+00> : vector<16x128xf32>
    %82 = tpu.matmul %80, %81, %cst_28 {dimension_numbers = #tpu.dot_dimension_numbers<[1], [0], [0], [1], [0, 0, 1, 1], [], []>} : vector<16x128xbf16>, vector<128x128xbf16>, vector<16x128xf32> -> vector<16x128xf32>
    %83 = vector.broadcast %5 : vector<1x128xf32> to vector<16x128xf32>
    %84 = arith.addf %82, %83 : vector<16x128xf32>
    %85 = arith.addf %72, %84 : vector<16x128xf32>
    %cst_29 = arith.constant dense<0.000000e+00> : vector<16xf32>
    %86 = vector.multi_reduction <add>, %85, %cst_29 [1] : vector<16x128xf32> to vector<16xf32>
    %87 = vector.shape_cast %86 : vector<16xf32> to vector<16x1xf32>
    %cst_30 = arith.constant 1.280000e+02 : f32
    %88 = vector.broadcast %cst_30 : f32 to vector<16x1xf32>
    %89 = arith.divf %87, %88 : vector<16x1xf32>
    %90 = vector.broadcast %89 : vector<16x1xf32> to vector<16x128xf32>
    %91 = arith.subf %85, %90 : vector<16x128xf32>
    %92 = arith.mulf %91, %91 : vector<16x128xf32>
    %cst_31 = arith.constant dense<0.000000e+00> : vector<16xf32>
    %93 = vector.multi_reduction <add>, %92, %cst_31 [1] : vector<16x128xf32> to vector<16xf32>
    %94 = vector.shape_cast %93 : vector<16xf32> to vector<16x1xf32>
    %cst_32 = arith.constant 1.280000e+02 : f32
    %95 = vector.broadcast %cst_32 : f32 to vector<16x1xf32>
    %96 = arith.divf %94, %95 : vector<16x1xf32>
    %97 = vector.broadcast %89 : vector<16x1xf32> to vector<16x128xf32>
    %98 = arith.subf %85, %97 : vector<16x128xf32>
    %cst_33 = arith.constant 9.99999974E-6 : f32
    %99 = vector.broadcast %cst_33 : f32 to vector<16x1xf32>
    %100 = arith.addf %96, %99 : vector<16x1xf32>
    %101 = math.rsqrt %100 : vector<16x1xf32>
    %102 = vector.broadcast %101 : vector<16x1xf32> to vector<16x128xf32>
    %103 = arith.mulf %98, %102 : vector<16x128xf32>
    %104 = vector.broadcast %6 : vector<1x128xf32> to vector<16x128xf32>
    %105 = arith.mulf %103, %104 : vector<16x128xf32>
    %106 = vector.broadcast %7 : vector<1x128xf32> to vector<16x128xf32>
    %107 = arith.addf %105, %106 : vector<16x128xf32>
    %108 = vector.shape_cast %107 : vector<16x128xf32> to vector<2x8x128xf32>
    %cst_34 = arith.constant dense<0.000000e+00> : vector<2x128xf32>
    %109 = vector.multi_reduction <add>, %108, %cst_34 [1] : vector<2x8x128xf32> to vector<2x128xf32>
    %110 = arith.truncf %109 : vector<2x128xf32> to vector<2x128xbf16>
    %c0_35 = arith.constant 0 : index
    %c0_36 = arith.constant 0 : index
    %111 = vector.load %arg8[%c0_35, %c0_36] : memref<128x128xbf16, #tpu.memory_space<vmem>>, vector<128x128xbf16>
    %cst_37 = arith.constant dense<0.000000e+00> : vector<2x128xf32>
    %112 = tpu.matmul %110, %111, %cst_37 {dimension_numbers = #tpu.dot_dimension_numbers<[1], [0], [0], [1], [0, 0, 1, 1], [], []>} : vector<2x128xbf16>, vector<128x128xbf16>, vector<2x128xf32> -> vector<2x128xf32>
    %113 = vector.broadcast %8 : vector<1x128xf32> to vector<2x128xf32>
    %114 = arith.addf %112, %113 : vector<2x128xf32>
    %c0_38 = arith.constant 0 : index
    %c0_39 = arith.constant 0 : index
    %115 = vector.load %arg10[%c0_38, %c0_39] : memref<2x128xf32, #tpu.memory_space<vmem>>, vector<2x128xf32>
    tpu.vector_store %arg10[%c0_38, %c0_39], %114 {strides = array<i32>} : memref<2x128xf32, #tpu.memory_space<vmem>>, vector<2x128xf32>,
    return
  }
  func.func @transform_0(%arg0: i32) -> (i32, i32, i32) {
    %c0_i32 = arith.constant 0 : i32
    %c0_i32_0 = arith.constant 0 : i32
    %c0_i32_1 = arith.constant 0 : i32
    return %arg0, %c0_i32, %c0_i32_0 : i32, i32, i32
  }
  func.func @transform_1(%arg0: i32) -> (i32, i32) {
    %c0_i32 = arith.constant 0 : i32
    %c0_i32_0 = arith.constant 0 : i32
    %c0_i32_1 = arith.constant 0 : i32
    return %c0_i32, %c0_i32_0 : i32, i32
  }
  func.func @transform_2(%arg0: i32) -> (i32, i32) {
    %c0_i32 = arith.constant 0 : i32
    %c0_i32_0 = arith.constant 0 : i32
    %c0_i32_1 = arith.constant 0 : i32
    return %c0_i32, %c0_i32_0 : i32, i32
  }
  func.func @transform_3(%arg0: i32) -> (i32, i32) {
    %c0_i32 = arith.constant 0 : i32
    %c0_i32_0 = arith.constant 0 : i32
    %c0_i32_1 = arith.constant 0 : i32
    return %c0_i32, %c0_i32_0 : i32, i32
  }
  func.func @transform_4(%arg0: i32) -> (i32, i32) {
    %c0_i32 = arith.constant 0 : i32
    %c0_i32_0 = arith.constant 0 : i32
    %c0_i32_1 = arith.constant 0 : i32
    return %c0_i32, %c0_i32_0 : i32, i32
  }
  func.func @transform_5(%arg0: i32) -> (i32, i32) {
    %c0_i32 = arith.constant 0 : i32
    %c0_i32_0 = arith.constant 0 : i32
    %c0_i32_1 = arith.constant 0 : i32
    return %c0_i32, %c0_i32_0 : i32, i32
  }
  func.func @transform_6(%arg0: i32) -> (i32, i32) {
    %c0_i32 = arith.constant 0 : i32
    %c0_i32_0 = arith.constant 0 : i32
    %c0_i32_1 = arith.constant 0 : i32
    return %c0_i32, %c0_i32_0 : i32, i32
  }
  func.func @transform_7(%arg0: i32) -> (i32, i32) {
    %c0_i32 = arith.constant 0 : i32
    %c0_i32_0 = arith.constant 0 : i32
    %c0_i32_1 = arith.constant 0 : i32
    return %c0_i32, %c0_i32_0 : i32, i32
  }
  func.func @transform_8(%arg0: i32) -> (i32, i32) {
    %c0_i32 = arith.constant 0 : i32
    %c0_i32_0 = arith.constant 0 : i32
    %c0_i32_1 = arith.constant 0 : i32
    return %c0_i32, %c0_i32_0 : i32, i32
  }
  func.func @transform_9(%arg0: i32) -> (i32, i32) {
    %c0_i32 = arith.constant 0 : i32
    %c0_i32_0 = arith.constant 0 : i32
    return %arg0, %c0_i32 : i32, i32
  }
}

</mosaic_0001>

<bundles_post_ra>
// kernel: tpu_custom_call.1
= control target key start
LH: loop header
LB: loop body
LE: loop exit
PB: predicated region body
PF: predicated region fallthrough
CT: control target
= control target key end

     0   :  { %14 = vsyncpa [#allocation3], 0  ;;  %s2917_s0 = inlined_call_operand.hbm [shape: f32[2,8,128], index: 0, kind: input, shape index: {}]   ;;  %s2918_s1 = inlined_call_operand.hbm [shape: bf16[128,384], index: 1, kind: input, shape index: {}]   ;;  %s2919_s2 = inlined_call_operand.vmem [shape: f32[1,384], index: 2, kind: input, shape index: {}]   ;;  %s2920_s3 = inlined_call_operand.hbm [shape: bf16[128,128], index: 3, kind: input, shape index: {}]   ;;  %s2921_s4 = inlined_call_operand.hbm [shape: bf16[128,128], index: 4, kind: input, shape index: {}]   ;;  %s2922_s5 = inlined_call_operand.hbm [shape: bf16[128,128], index: 5, kind: input, shape index: {}]   ;;  %s2923_s6 = inlined_call_operand.hbm [shape: bf16[128,128], index: 6, kind: input, shape index: {}]   ;;  %s2924_s7 = inlined_call_operand.hbm [shape: bf16[128,128], index: 7, kind: input, shape index: {}]   ;;  %s2925_s8 = inlined_call_operand.vmem [shape: f32[8,128], index: 8, kind: input, shape index: {}]   ;;  %s2926_s9 = inlined_call_operand.hbm [shape: f32[2,128], index: 9, kind: output, shape index: {}]  }
   0x1   :  { %15 = vsyncpa [#allocation6], 0 }
   0x2   :  { %16 = vsyncpa [#allocation9], 0 }
   0x3   :  { %17 = vsyncpa [#allocation12], 0 }
   0x4   :  { %18 = vsyncpa [#allocation4], 0  ;;  %s2373_s30 = smov [#allocation5]   ;;  %s2187_s13 = scalar_lea.hbm %s2918_s1, 3072 }
   0x5   :  { %s36_s10 = sshll.u32 %s2373_s30, 4  ;;  %p2188_p0 = scmp.ne.s32.totalorder %s2918_s1, %s2187_s13  ;;  %s37_s10 = int_to_ptr.vmem [resolvable:$true] %s36_s10 }
   0x6   :  { %p2191_p1 = scmp.lt.u32.totalorder %s2187_s13, %s2918_s1 }
   0x8   :  { %p2193_p2 = pnand %p2191_p1, %p2188_p0 }
   0xa   :  { %2196 = shalt.err (!%p2193_p2)
}
   0xb   :  { %s2197_s18 = scalar_lea.vmem %s37_s10, 3072  ;;  %p2202_p4 = scmp.lt.s32.totalorder %s37_s10, %s37_s10 }
   0xc   :  { %p2198_p3 = scmp.ne.s32.totalorder %s37_s10, %s2197_s18  ;;  %p2203_p5 = scmp.lt.s32.totalorder %s2197_s18, %s2197_s18 }
   0xe   :  { %p2204_p6 = por %p2203_p5, %p2202_p4 }
  0x10   :  { %p2205_p7 = pnand %p2204_p6, %p2198_p3 }
  0x12   :  { %2208 = shalt.err (!%p2205_p7)
}
  0x13   :  { %s2374_s19 = smov 192   ;;  %s2375_s20 = smov 12  }
  0x14   :  { %42 = dma.hbm_to_vmem [thread:$0]  %s2918_s1, 3072, %s37_s10, [#allocation6], %s2374_s19, %s2374_s19, %s2375_s20  }
  0x15   :  { %s2376_s23 = smov [#allocation8]   ;;  %s2377_s25 = smov [#allocation11]  }
  0x16   :  { %s62_s24 = sshll.u32 %s2376_s23, 4  ;;  %s86_s26 = sshll.u32 %s2377_s25, 4  ;;  %s63_s24 = int_to_ptr.vmem [resolvable:$true] %s62_s24  ;;  %s87_s26 = int_to_ptr.vmem [resolvable:$true] %s86_s26 }
  0x17   :  { %s2209_s29 = scalar_lea.hbm %s2921_s4, 1024 }
  0x18   :  { %p2210_p8 = scmp.ne.s32.totalorder %s2921_s4, %s2209_s29  ;;  %p2213_p9 = scmp.lt.u32.totalorder %s2209_s29, %s2921_s4 }
  0x1a   :  { %p2215_p10 = pnand %p2213_p9, %p2210_p8 }
  0x1c   :  { %2218 = shalt.err (!%p2215_p10)
}
  0x1d   :  { %s2219_s1 = scalar_lea.vmem %s63_s24, 1024  ;;  %p2224_p12 = scmp.lt.s32.totalorder %s63_s24, %s63_s24 }
  0x1e   :  { %p2220_p11 = scmp.ne.s32.totalorder %s63_s24, %s2219_s1  ;;  %p2225_p13 = scmp.lt.s32.totalorder %s2219_s1, %s2219_s1 }
  0x20   :  { %p2226_p0 = por %p2225_p13, %p2224_p12 }
  0x22   :  { %p2227_p1 = pnand %p2226_p0, %p2220_p11 }
  0x24   :  { %2230 = shalt.err (!%p2227_p1)
}
  0x25   :  { %s2378_s10 = smov 64   ;;  %s2379_s14 = smov 4  }
  0x26   :  { %68 = dma.hbm_to_vmem [thread:$0]  %s2921_s4, 1024, %s63_s24, [#allocation9], %s2378_s10, %s2378_s10, %s2379_s14  }
  0x27   :  { %s2231_s19 = scalar_lea.hbm %s2923_s6, 1024 }
  0x28   :  { %p2232_p2 = scmp.ne.s32.totalorder %s2923_s6, %s2231_s19  ;;  %p2235_p3 = scmp.lt.u32.totalorder %s2231_s19, %s2923_s6 }
  0x2a   :  { %p2237_p4 = pnand %p2235_p3, %p2232_p2 }
  0x2c   :  { %2240 = shalt.err (!%p2237_p4)
}
  0x2d   :  { %s2241_s25 = scalar_lea.vmem %s87_s26, 1024  ;;  %p2246_p6 = scmp.lt.s32.totalorder %s87_s26, %s87_s26 }
  0x2e   :  { %p2242_p5 = scmp.ne.s32.totalorder %s87_s26, %s2241_s25  ;;  %p2247_p7 = scmp.lt.s32.totalorder %s2241_s25, %s2241_s25 }
  0x30   :  { %p2248_p8 = por %p2247_p7, %p2246_p6 }
  0x32   :  { %p2249_p9 = pnand %p2248_p8, %p2242_p5 }
  0x34   :  { %2252 = shalt.err (!%p2249_p9)
}
  0x35   :  { %92 = dma.hbm_to_vmem [thread:$0]  %s2923_s6, 1024, %s87_s26, [#allocation12], %s2378_s10, %s2378_s10, %s2379_s14  }
  0x36   :  { %s2380_s27 = smov [#allocation2]   ;;  %s2253_s11 = scalar_lea.hbm %s2917_s0, 256 }
  0x37   :  { %s24_s28 = sshll.u32 %s2380_s27, 4  ;;  %p2254_p10 = scmp.ne.s32.totalorder %s2917_s0, %s2253_s11  ;;  %s25_s28 = int_to_ptr.vmem [resolvable:$true] %s24_s28 }
  0x38   :  { %p2257_p11 = scmp.lt.u32.totalorder %s2253_s11, %s2917_s0 }
  0x3a   :  { %p2259_p12 = pnand %p2257_p11, %p2254_p10 }
  0x3c   :  { %2262 = shalt.err (!%p2259_p12)
}
  0x3d   :  { %s2263_s16 = scalar_lea.vmem %s25_s28, 256  ;;  %p2268_p0 = scmp.lt.s32.totalorder %s25_s28, %s25_s28 }
  0x3e   :  { %p2264_p13 = scmp.ne.s32.totalorder %s25_s28, %s2263_s16  ;;  %p2269_p1 = scmp.lt.s32.totalorder %s2263_s16, %s2263_s16 }
  0x40   :  { %p2270_p2 = por %p2269_p1, %p2268_p0 }
  0x42   :  { %p2271_p3 = pnand %p2270_p2, %p2264_p13 }
  0x44   :  { %2274 = shalt.err (!%p2271_p3)
}
  0x45   :  { %s2381_s6 = smov 128   ;;  %s2382_s26 = smov 8  }
  0x46   :  { %30 = dma.hbm_to_vmem [thread:$0]  %s2917_s0, 256, %s25_s28, [#allocation3], %s2381_s6, %s2381_s6, %s2382_s26  }
  0x47   :  { %s2383_s19 = smov [#allocation7]   ;;  %s2384_s21 = smov [#allocation10]  }
  0x48   :  { %s50_s20 = sshll.u32 %s2383_s19, 4  ;;  %s74_s22 = sshll.u32 %s2384_s21, 4  ;;  %s51_s20 = int_to_ptr.vmem [resolvable:$true] %s50_s20  ;;  %s2495_s22 = int_to_ptr.vmem [resolvable:$true] %s74_s22 }
  0x49   :  { %s2275_s4 = scalar_lea.hbm %s2920_s3, 1024 }
  0x4a   :  { %p2276_p4 = scmp.ne.s32.totalorder %s2920_s3, %s2275_s4  ;;  %p2279_p5 = scmp.lt.u32.totalorder %s2275_s4, %s2920_s3 }
  0x4c   :  { %p2281_p6 = pnand %p2279_p5, %p2276_p4 }
  0x4e   :  { %2284 = shalt.err (!%p2281_p6)
}
  0x4f   :  { %s2285_s0 = scalar_lea.vmem %s51_s20, 1024  ;;  %p2290_p8 = scmp.lt.s32.totalorder %s51_s20, %s51_s20 }
  0x50   :  { %p2286_p7 = scmp.ne.s32.totalorder %s51_s20, %s2285_s0  ;;  %p2291_p9 = scmp.lt.s32.totalorder %s2285_s0, %s2285_s0 }
  0x52   :  { %p2292_p10 = por %p2291_p9, %p2290_p8 }
  0x54   :  { %p2293_p11 = pnand %p2292_p10, %p2286_p7 }
  0x56   :  { %2296 = shalt.err (!%p2293_p11)
}
  0x57   :  { %56 = dma.hbm_to_vmem [thread:$0]  %s2920_s3, 1024, %s51_s20, [#allocation6], %s2378_s10, %s2378_s10, %s2379_s14  }
  0x58   :  { %s2297_s1 = scalar_lea.hbm %s2922_s5, 1024 }
  0x59   :  { %p2298_p12 = scmp.ne.s32.totalorder %s2922_s5, %s2297_s1  ;;  %p2301_p13 = scmp.lt.u32.totalorder %s2297_s1, %s2922_s5 }
  0x5b   :  { %p2303_p0 = pnand %p2301_p13, %p2298_p12 }
  0x5d   :  { %2306 = shalt.err (!%p2303_p0)
}
  0x5e   :  { %s2307_s17 = scalar_lea.vmem %s2495_s22, 1024  ;;  %p2312_p2 = scmp.lt.s32.totalorder %s2495_s22, %s2495_s22 }
  0x5f   :  { %p2308_p1 = scmp.ne.s32.totalorder %s2495_s22, %s2307_s17  ;;  %p2313_p3 = scmp.lt.s32.totalorder %s2307_s17, %s2307_s17 }
  0x61   :  { %p2314_p4 = por %p2313_p3, %p2312_p2 }
  0x63   :  { %p2315_p5 = pnand %p2314_p4, %p2308_p1 }
  0x65   :  { %2318 = shalt.err (!%p2315_p5)
}
  0x66   :  { %80 = dma.hbm_to_vmem [thread:$0]  %s2922_s5, 1024, %s2495_s22, [#allocation9], %s2378_s10, %s2378_s10, %s2379_s14  }
  0x67   :  { %s2385_s19 = smov [#allocation13]   ;;  %s2319_s25 = scalar_lea.hbm %s2924_s7, 1024 }
  0x68   :  { %s98_s20 = sshll.u32 %s2385_s19, 4  ;;  %p2320_p6 = scmp.ne.s32.totalorder %s2924_s7, %s2319_s25  ;;  %s99_s20 = int_to_ptr.vmem [resolvable:$true] %s98_s20 }
  0x69   :  { %p2323_p7 = scmp.lt.u32.totalorder %s2319_s25, %s2924_s7 }
  0x6b   :  { %p2325_p8 = pnand %p2323_p7, %p2320_p6 }
  0x6d   :  { %2328 = shalt.err (!%p2325_p8)
}
  0x6e   :  { %s2329_s30 = scalar_lea.vmem %s99_s20, 1024  ;;  %p2334_p10 = scmp.lt.s32.totalorder %s99_s20, %s99_s20 }
  0x6f   :  { %p2330_p9 = scmp.ne.s32.totalorder %s99_s20, %s2329_s30  ;;  %p2335_p11 = scmp.lt.s32.totalorder %s2329_s30, %s2329_s30 }
  0x71   :  { %p2336_p12 = por %p2335_p11, %p2334_p10 }
  0x73   :  { %p2337_p13 = pnand %p2336_p12, %p2330_p9 }
  0x75   :  { %2340 = shalt.err (!%p2337_p13)
}
  0x76   :  { %104 = dma.hbm_to_vmem [thread:$0]  %s2924_s7, 1024, %s99_s20, [#allocation12], %s2378_s10, %s2378_s10, %s2379_s14  }
  0x77   :  { %2363 = dma.done.wait [#allocation3], 256  }
  0x78   :  { %2364 = vsyncadd [#allocation3], 4294967040 }
  0x79   :  { %2365 = dma.done.wait [#allocation6], 4096  }
  0x7a   :  { %2366 = vsyncadd [#allocation6], 4294963200 }
  0x7b   :  { %2367 = dma.done.wait [#allocation9], 2048  }
  0x7c   :  { %2368 = vsyncadd [#allocation9], 4294965248 }
  0x7d   :  { %2369 = dma.done.wait [#allocation12], 2048  }
  0x7e   :  { %2370 = vsyncadd [#allocation12], 4294965248  ;;  %v2386_v0 = vmov 0   ;;  %v2041_v1 = vld [vmem:[#allocation5 + $0x4] ss:$12 sps:$4 sm:$0xff]   ;;  %v131_v18 = vld [vmem:[#allocation2 + $0x8] sm:$0xff]  ;;  %v167_v37 = vlaneseq }
  0x7f   :  { %342 = vmatprep.mubr.bf16.mxu0 %v2386_v0  ;;  %v2043_v2 = vld [vmem:[#allocation5] ss:$12 sps:$4 sm:$0xff]   ;;  %310 = vmatprep.subr.bf16.mxu0 %v2041_v1  ;;  %v2044_v3 = vld [vmem:[#allocation5 + $0x1c] ss:$12 sps:$4 sm:$0xff]   ;;  %v2046_v4 = vld [vmem:[#allocation5 + $0x18] ss:$12 sps:$4 sm:$0xff]  }
  0x80   :  { %311 = vmatpush1.bf16.msra.mxu0 %v2043_v2  ;;  %v2047_v5 = vld [vmem:[#allocation5 + $0x34] ss:$12 sps:$4 sm:$0xff]   ;;  %v2049_v6 = vld [vmem:[#allocation5 + $0x30] ss:$12 sps:$4 sm:$0xff]   ;;  %v2050_v7 = vld [vmem:[#allocation5 + $0x4c] ss:$12 sps:$4 sm:$0xff]  }
  0x81   :  { %312 = vmatprep.subr.bf16.mxu0 %v2044_v3  ;;  %v2052_v8 = vld [vmem:[#allocation5 + $0x48] ss:$12 sps:$4 sm:$0xff]   ;;  %v2053_v9 = vld [vmem:[#allocation5 + $0x64] ss:$12 sps:$4 sm:$0xff]   ;;  %v2055_v10 = vld [vmem:[#allocation5 + $0x60] ss:$12 sps:$4 sm:$0xff]  }
  0x82   :  { %v2056_v11 = vld [vmem:[#allocation5 + $0x7c] ss:$12 sps:$4 sm:$0xff]   ;;  %v2058_v12 = vld [vmem:[#allocation5 + $0x78] ss:$12 sps:$4 sm:$0xff]   ;;  %v2059_v13 = vld [vmem:[#allocation5 + $0x94] ss:$12 sps:$4 sm:$0xff]  }
  0x83   :  { %v2061_v14 = vld [vmem:[#allocation5 + $0x90] ss:$12 sps:$4 sm:$0xff]   ;;  %v2062_v15 = vld [vmem:[#allocation5 + $0xac] ss:$12 sps:$4 sm:$0xff]   ;;  %v2064_v16 = vld [vmem:[#allocation5 + $0xa8] ss:$12 sps:$4 sm:$0xff]  }
  0x84   :  { %313 = vmatpush1.bf16.msra.mxu0 %v2046_v4  ;;  %v130_v17 = vld [vmem:[#allocation2] sm:$0xff]  ;;  %v2065_v19 = vld [vmem:[#allocation7] sm:$0xff]   ;;  %v2066_v21 = vld [vmem:[#allocation7 + $0x8] sm:$0xff]   ;;  %v2387_v28 = vmov 0.0   ;;  %vm2388_vm0 = vmmov 0   ;;  %v2561_v38 = vshrl.u32 %v167_v37, 7 }
  0x85   :  { %314 = vmatprep.subr.bf16.mxu0 %v2047_v5  ;;  %v132_v20 = vpack.c.bf16 %v131_v18, %v130_v17  ;;  %v2067_v22 = vld [vmem:[#allocation7 + $0x10] sm:$0xff]   ;;  %v2068_v23 = vld [vmem:[#allocation7 + $0x18] sm:$0xff]   ;;  %v2069_v24 = vld [vmem:[#allocation7 + $0x20] sm:$0xff]   ;;  %1891 = vmatprep.subr.bf16.mxu1 %v2387_v28  ;;  %v2389_v39 = vmov 1966171168   ;;  %vm1211_vm1 = vcmask 1041409  }
  0x86   :  { %v2070_v25 = vld [vmem:[#allocation7 + $0x28] sm:$0xff]   ;;  %v2071_v26 = vld [vmem:[#allocation7 + $0x30] sm:$0xff]   ;;  %v2073_v29 = vld [vmem:[#allocation7 + $0x38] sm:$0xff]   ;;  %1907 = vmatprep.mubr.msk.bf16.mxu1 %vm2388_vm0, %v2387_v28  ;;  %v398_v40 = vunpack.c.l.s4 %v2389_v39  ;;  %v2564_v41 = vsub.s32 0, %v2561_v38  ;;  %v173_v45 = vsub.s32 1, %v2561_v38  ;;  %vm1213_vm2 = vcmask 1042434  }
  0x87   :  { %v2072_v27 = vld [vmem:[#allocation5 + $0x8] ss:$12 sps:$4 sm:$0xff]   ;;  %v2074_v30 = vld [vmem:[#allocation5 + $0x20] ss:$12 sps:$4 sm:$0xff]   ;;  %v2075_v31 = vld [vmem:[#allocation5 + $0x38] ss:$12 sps:$4 sm:$0xff]  }
  0x88   :  { %315 = vmatpush1.bf16.msra.mxu0 %v2049_v6  ;;  %1892 = vmatpush3.bf16.msra.mxu1 %v2072_v27  ;;  %v2076_v32 = vld [vmem:[#allocation5 + $0x50] ss:$12 sps:$4 sm:$0xff]   ;;  %v2077_v33 = vld [vmem:[#allocation5 + $0x68] ss:$12 sps:$4 sm:$0xff]   ;;  %v2078_v34 = vld [vmem:[#allocation5 + $0x80] ss:$12 sps:$4 sm:$0xff]   ;;  %v399_v43 = vunpack.c.0.s8 %v398_v40 }
  0x89   :  { %316 = vmatprep.subr.bf16.mxu0 %v2050_v7  ;;  %1893 = vmatprep.subr.bf16.mxu1 %v2387_v28  ;;  %v2079_v35 = vld [vmem:[#allocation5 + $0x98] ss:$12 sps:$4 sm:$0xff]   ;;  %v2080_v36 = vld [vmem:[#allocation5 + $0xb0] ss:$12 sps:$4 sm:$0xff]   ;;  %vm1215_vm3 = vcmask 1043459   ;;  %vm1217_vm4 = vcmask 1044484  }
  0x8a   :  { %v2569_v42 = vld [vmem:[%s2919_s2] sm:$0x7]  ;;  %v402_v46 = vsub.s32 %v399_v43, %v2561_v38  ;;  %vm1219_vm5 = vcmask 1045509   ;;  %vm1221_vm6 = vcmask 1046534   ;;  %vm1223_vm7 = vcmask 1047559  }
  0x8b   :  { %v170_v44 = vrot.slane %v2569_v42, %v2564_v41  ;;  %v174_v50 = vrot.slane %v2569_v42, %v173_v45 }
  0x8c   :  { %317 = vmatpush1.bf16.msra.mxu0 %v2052_v8  ;;  %1894 = vmatpush3.bf16.msra.mxu1 %v2074_v30 }
  0x8d   :  { %318 = vmatprep.subr.bf16.mxu0 %v2053_v9  ;;  %1895 = vmatprep.subr.bf16.mxu1 %v2387_v28 }
  0x90   :  { %319 = vmatpush1.bf16.msra.mxu0 %v2055_v10  ;;  %1896 = vmatpush3.bf16.msra.mxu1 %v2075_v31 }
  0x91   :  { %320 = vmatprep.subr.bf16.mxu0 %v2056_v11  ;;  %1897 = vmatprep.subr.bf16.mxu1 %v2387_v28 }
  0x94   :  { %321 = vmatpush1.bf16.msra.mxu0 %v2058_v12  ;;  %1898 = vmatpush3.bf16.msra.mxu1 %v2076_v32 }
  0x95   :  { %322 = vmatprep.subr.bf16.mxu0 %v2059_v13  ;;  %1899 = vmatprep.subr.bf16.mxu1 %v2387_v28 }
  0x98   :  { %323 = vmatpush1.bf16.msra.mxu0 %v2061_v14  ;;  %1900 = vmatpush3.bf16.msra.mxu1 %v2077_v33 }
  0x99   :  { %324 = vmatprep.subr.bf16.mxu0 %v2062_v15  ;;  %1901 = vmatprep.subr.bf16.mxu1 %v2387_v28 }
  0x9c   :  { %325 = vmatpush1.bf16.msra.mxu0 %v2064_v16  ;;  %1902 = vmatpush3.bf16.msra.mxu1 %v2078_v34 }
  0x9d   :  { %1911 = vmatprep.subr.bf16.mxu0 %v2065_v19  ;;  %1903 = vmatprep.subr.bf16.mxu1 %v2387_v28 }
  0x9f   :  { %343 = vmatmul.mubr.bf16.vlgmr.msra.gmra.mrb[0].mxu0 %v132_v20 }
  0xa0   :  { %1912 = vmatpush3.bf16.msra.mxu0 %v2065_v19  ;;  %1904 = vmatpush3.bf16.msra.mxu1 %v2079_v35 }
  0xa1   :  { %1913 = vmatprep.subr.bf16.mxu0 %v2066_v21  ;;  %1905 = vmatprep.subr.bf16.mxu1 %v2387_v28 }
  0xa4   :  { %1914 = vmatpush3.bf16.msra.mxu0 %v2066_v21  ;;  %1906 = vmatpush3.bf16.msra.mxu1 %v2080_v36 }
  0xa5   :  { %1915 = vmatprep.subr.bf16.mxu0 %v2067_v22  ;;  %1943 = vmatprep.subr.bf16.mxu1 %v2387_v28 }
  0xa7   :  { %1908 = vmatmul.mubr.bf16.vlgmr.msra.gmra.mrb[0].mxu1 %v132_v20 }
  0xa8   :  { %1916 = vmatpush3.bf16.msra.mxu0 %v2067_v22  ;;  %1959 = vmatprep.mubr.msk.bf16.mxu1 %vm2388_vm0, %v2387_v28 }
  0xa9   :  { %1917 = vmatprep.subr.bf16.mxu0 %v2068_v23 }
  0xac   :  { %1918 = vmatpush3.bf16.msra.mxu0 %v2068_v23 }
  0xad   :  { %1919 = vmatprep.subr.bf16.mxu0 %v2069_v24 }
  0xb0   :  { %1920 = vmatpush3.bf16.msra.mxu0 %v2069_v24 }
  0xb1   :  { %1921 = vmatprep.subr.bf16.mxu0 %v2070_v25 }
  0xb4   :  { %1922 = vmatpush3.bf16.msra.mxu0 %v2070_v25 }
  0xb5   :  { %1923 = vmatprep.subr.bf16.mxu0 %v2071_v26 }
  0xb8   :  { %1924 = vmatpush3.bf16.msra.mxu0 %v2071_v26 }
  0xb9   :  { %1925 = vmatprep.subr.bf16.mxu0 %v2073_v29 }
  0xbc   :  { %1926 = vmatpush3.bf16.msra.mxu0 %v2073_v29 }
  0xbd   :  { %1963 = vmatprep.subr.bf16.mxu0 %v2387_v28 }
 0x172   :  { %v344_v47 = vpop.f32.mrb[0].mxu0 }
 0x173   :  { %v345_v48 = vadd.f32 %v344_v47, %v170_v44  ;;  %v346_v49 = vpop.f32.mrb[1].mxu0 }
 0x174   :  { %v348_v51 = vpop.f32.mrb[2].mxu0  ;;  %v347_v60 = vadd.f32 %v346_v49, %v174_v50 }
 0x175   :  { %v396_v52 = vcombine.high %v345_v48, %v345_v48  ;;  %v403_v53 = vrot.slane %v345_v48, %v402_v46  ;;  %v349_v54 = vadd.f32 %v348_v51, %v170_v44  ;;  %v350_v55 = vpop.f32.mrb[3].mxu0 }
 0x176   :  { %v351_v62 = vadd.f32 %v350_v55, %v174_v50 }
 0x177   :  { %v410_v56 = vrot.slane %v396_v52, %v402_v46  ;;  %v411_v57 = vcombine.high %v403_v53, %v403_v53  ;;  %v419_v58 = vrot.slane %v403_v53, %v402_v46  ;;  %v445_v59 = vcombine.high %v349_v54, %v349_v54 }
 0x178   :  { %v452_v61 = vrot.slane %v349_v54, %v402_v46 }
 0x179   :  { %v412_v63 = vcombine.high %v410_v56, %v410_v56  ;;  %v426_v0 = vrot.slane %v410_v56, %v402_v46  ;;  %v433_v1 = vrot.slane %v411_v57, %v402_v46  ;;  %v441_v2 = vcombine.high %v419_v58, %v419_v58 }
 0x17a   :  { %v497_v3 = vrot.slane %v419_v58, %v2564_v41  ;;  %v459_v4 = vrot.slane %v445_v59, %v402_v46  ;;  %v460_v5 = vcombine.high %v452_v61, %v452_v61  ;;  %v468_v6 = vrot.slane %v452_v61, %v402_v46 }
 0x17b   :  { %v440_v7 = vrot.slane %v412_v63, %v402_v46  ;;  %v442_v8 = vcombine.high %v426_v0, %v426_v0  ;;  %v443_v9 = vcombine.high %v433_v1, %v433_v1  ;;  %v505_v10 = vrot.slane %v441_v2, %v2564_v41 }
 0x17c   :  { %v461_v11 = vcombine.high %v459_v4, %v459_v4  ;;  %v475_v12 = vrot.slane %v459_v4, %v402_v46  ;;  %v482_v13 = vrot.slane %v460_v5, %v402_v46  ;;  %v490_v14 = vcombine.high %v468_v6, %v468_v6  ;;  %v2081_v4 = vld [vmem:[#allocation8] sm:$0xff]   ;;  %v2083_v5 = vld [vmem:[#allocation8 + $0x10] sm:$0xff]  }
 0x17d   :  { %v509_v15 = vrot.slane %v443_v9, %v2564_v41  ;;  %v529_v16 = vrot.slane %v468_v6, %v2564_v41  ;;  %v501_v17 = vrot.slane %v433_v1, %v2564_v41  ;;  %v574_v18 = vmul.f32 %v497_v3, %v347_v60  ;;  %1944 = vmatpush3.bf16.msra.mxu1 %v2081_v4  ;;  %v2084_v6 = vld [vmem:[#allocation8 + $0x18] sm:$0xff]   ;;  %v2087_v9 = vld [vmem:[#allocation8 + $0x30] sm:$0xff]  }
 0x17e   :  { %v489_v19 = vrot.slane %v461_v11, %v402_v46  ;;  %v491_v20 = vcombine.high %v475_v12, %v475_v12  ;;  %v492_v21 = vcombine.high %v482_v13, %v482_v13  ;;  %v576_v22 = vmul.f32 %v505_v10, %v347_v60  ;;  %1945 = vmatprep.subr.bf16.mxu1 %v2387_v28  ;;  %v2088_v10 = vld [vmem:[#allocation8 + $0x38] sm:$0xff]  }
 0x17f   :  { %v575_v23 = vmul.f32 %v501_v17, %v347_v60  ;;  %v577_v24 = vmul.f32 %v509_v15, %v347_v60  ;;  %v513_v25 = vrot.slane %v426_v0, %v2564_v41  ;;  %v517_v26 = vrot.slane %v440_v7, %v2564_v41 }
 0x180   :  { %v444_v27 = vcombine.high %v440_v7, %v440_v7  ;;  %v521_v29 = vrot.slane %v442_v8, %v2564_v41  ;;  %v533_v30 = vrot.slane %v482_v13, %v2564_v41  ;;  %v582_v31 = vmul.f32 %v529_v16, %v351_v62  ;;  %v2085_v7 = vld [vmem:[#allocation8 + $0x20] sm:$0xff]   ;;  %v2086_v8 = vld [vmem:[#allocation8 + $0x28] sm:$0xff]  }
 0x181   :  { %v590_v32 = vpack.c.bf16 %v575_v23, %v574_v18  ;;  %v591_v33 = vpack.c.bf16 %v577_v24, %v576_v22  ;;  %v578_v34 = vmul.f32 %v513_v25, %v347_v60  ;;  %v579_v35 = vmul.f32 %v517_v26, %v347_v60 }
 0x182   :  { %v525_v36 = vrot.slane %v444_v27, %v2564_v41  ;;  %v580_v37 = vmul.f32 %v521_v29, %v347_v60  ;;  %v583_v39 = vmul.f32 %v533_v30, %v351_v62  ;;  %v537_v40 = vrot.slane %v490_v14, %v2564_v41 }
 0x183   :  { %1927 = vmatprep.mubr.bf16.mxu0 %v590_v32  ;;  %v592_v43 = vpack.c.bf16 %v579_v35, %v578_v34  ;;  %v541_v44 = vrot.slane %v492_v21, %v2564_v41  ;;  %v545_v46 = vrot.slane %v475_v12, %v2564_v41  ;;  %v549_v47 = vrot.slane %v489_v19, %v2564_v41 }
 0x184   :  { %1928 = vmatmul.mubr.bf16.vlgmr.msra.gmra.mrb[4].mxu0 %v591_v33  ;;  %v581_v48 = vmul.f32 %v525_v36, %v347_v60  ;;  %v594_v49 = vpack.c.bf16 %v583_v39, %v582_v31  ;;  %v584_v50 = vmul.f32 %v537_v40, %v351_v62  ;;  %v493_v51 = vcombine.high %v489_v19, %v489_v19  ;;  %v2596_v60 = vpop.f32.mrb[0].mxu1 }
 0x185   :  { %1931 = vmatprep.mubr.bf16.mxu0 %v592_v43  ;;  %v585_v52 = vmul.f32 %v541_v44, %v351_v62  ;;  %v586_v53 = vmul.f32 %v545_v46, %v351_v62  ;;  %v587_v54 = vmul.f32 %v549_v47, %v351_v62  ;;  %v553_v55 = vrot.slane %v491_v20, %v2564_v41  ;;  %v1909_v1 = vpop.f32.mrb[1].mxu1 }
 0x186   :  { %v593_v56 = vpack.c.bf16 %v581_v48, %v580_v37  ;;  %v557_v57 = vrot.slane %v493_v51, %v2564_v41  ;;  %v2598_v2 = vpop.f32.mrb[2].mxu1  ;;  %v177_v40 = vsub.s32 2, %v2561_v38 }
 0x187   :  { %v595_v58 = vpack.c.bf16 %v585_v52, %v584_v50  ;;  %v596_v59 = vpack.c.bf16 %v587_v54, %v586_v53  ;;  %v588_v61 = vmul.f32 %v553_v55, %v351_v62  ;;  %v1910_v3 = vpop.f32.mrb[3].mxu1 }
 0x188   :  { %v589_v63 = vmul.f32 %v557_v57, %v351_v62  ;;  %v2082_v62 = vld [vmem:[#allocation8 + $0x8] sm:$0xff]  }
 0x189   :  { %1946 = vmatpush3.bf16.msra.mxu1 %v2082_v62 }
 0x18a   :  { %v597_v0 = vpack.c.bf16 %v589_v63, %v588_v61  ;;  %1947 = vmatprep.subr.bf16.mxu1 %v2387_v28 }
 0x18c   :  { %1932 = vmatmul.mubr.bf16.gmra.mrb[8].mxu0 %v593_v56 }
 0x18d   :  { %1935 = vmatprep.mubr.bf16.mxu0 %v594_v49  ;;  %1948 = vmatpush3.bf16.msra.mxu1 %v2083_v5 }
 0x18e   :  { %1949 = vmatprep.subr.bf16.mxu1 %v2387_v28 }
 0x191   :  { %1950 = vmatpush3.bf16.msra.mxu1 %v2084_v6 }
 0x192   :  { %1951 = vmatprep.subr.bf16.mxu1 %v2387_v28 }
 0x194   :  { %1936 = vmatmul.mubr.bf16.gmra.mrb[12].mxu0 %v595_v58 }
 0x195   :  { %1939 = vmatprep.mubr.bf16.mxu0 %v596_v59  ;;  %1952 = vmatpush3.bf16.msra.mxu1 %v2085_v7 }
 0x196   :  { %1953 = vmatprep.subr.bf16.mxu1 %v2387_v28 }
 0x199   :  { %1954 = vmatpush3.bf16.msra.mxu1 %v2086_v8 }
 0x19a   :  { %1955 = vmatprep.subr.bf16.mxu1 %v2387_v28 }
 0x19c   :  { %1940 = vmatmul.mubr.bf16.gmra.mrb[16].mxu0 %v597_v0 }
 0x19d   :  { %1979 = vmatprep.mubr.msk.bf16.mxu0 %vm2388_vm0, %v2387_v28  ;;  %1956 = vmatpush3.bf16.msra.mxu1 %v2087_v9 }
 0x19e   :  { %1957 = vmatprep.subr.bf16.mxu1 %v2387_v28 }
 0x1a1   :  { %1958 = vmatpush3.bf16.msra.mxu1 %v2088_v10 }
 0x1a2   :  { %1983 = vmatprep.subr.bf16.mxu1 %v2387_v28 }
 0x257   :  { %v1929_v11 = vpop.f32.mrb[4].mxu0 }
 0x258   :  { %v771_v12 = vrot.slane %v1929_v11, 4  ;;  %v696_v13 = vpop.f32.mrb[5].mxu0 }
 0x259   :  { %v759_v14 = vrot.slane %v696_v13, 4  ;;  %v1930_v15 = vpop.f32.mrb[6].mxu0 }
 0x25a   :  { %v772_v16 = vmax.f32 %v1929_v11, %v771_v12  ;;  %v777_v17 = vrot.slane %v1930_v15, 4  ;;  %v699_v18 = vpop.f32.mrb[7].mxu0 }
 0x25b   :  { %v760_v19 = vmax.f32 %v696_v13, %v759_v14  ;;  %v765_v20 = vrot.slane %v699_v18, 4 }
 0x25c   :  { %v773_v21 = vrot.slane %v772_v16, 2  ;;  %v778_v22 = vmax.f32 %v1930_v15, %v777_v17 }
 0x25d   :  { %v761_v23 = vrot.slane %v760_v19, 2  ;;  %v766_v24 = vmax.f32 %v699_v18, %v765_v20 }
 0x25e   :  { %v774_v25 = vmax.f32 %v772_v16, %v773_v21  ;;  %v779_v26 = vrot.slane %v778_v22, 2 }
 0x25f   :  { %v762_v27 = vmax.f32 %v760_v19, %v761_v23  ;;  %v767_v29 = vrot.slane %v766_v24, 2  ;;  %v2608_v30 = vpop.f32.mrb[8].mxu0 }
 0x260   :  { %v775_v31 = vrot.slane %v774_v25, 1  ;;  %v780_v32 = vmax.f32 %v778_v22, %v779_v26  ;;  %v795_v33 = vrot.slane %v2608_v30, 4  ;;  %v2611_v34 = vpop.f32.mrb[9].mxu0 }
 0x261   :  { %v763_v35 = vrot.slane %v762_v27, 1  ;;  %v768_v36 = vmax.f32 %v766_v24, %v767_v29  ;;  %v783_v37 = vrot.slane %v2611_v34, 4  ;;  %v2614_v39 = vpop.f32.mrb[10].mxu0 }
 0x262   :  { %v776_v43 = vmax.f32 %v774_v25, %v775_v31  ;;  %v781_v44 = vrot.slane %v780_v32, 1  ;;  %v796_v46 = vmax.f32 %v2608_v30, %v795_v33  ;;  %v801_v47 = vrot.slane %v2614_v39, 4  ;;  %v2619_v48 = vpop.f32.mrb[11].mxu0 }
 0x263   :  { %v764_v49 = vmax.f32 %v762_v27, %v763_v35  ;;  %v769_v50 = vrot.slane %v768_v36, 1  ;;  %v784_v51 = vmax.f32 %v2611_v34, %v783_v37  ;;  %v789_v52 = vrot.slane %v2619_v48, 4 }
 0x264   :  { %v857_v53 = vsub.f32 %v1929_v11, %v776_v43  ;;  %v782_v54 = vmax.f32 %v780_v32, %v781_v44  ;;  %v797_v55 = vrot.slane %v796_v46, 2  ;;  %v802_v56 = vmax.f32 %v2614_v39, %v801_v47 }
 0x265   :  { %v855_v57 = vsub.f32 %v696_v13, %v764_v49  ;;  %v770_v58 = vmax.f32 %v768_v36, %v769_v50  ;;  %v785_v59 = vrot.slane %v784_v51, 2  ;;  %v790_v61 = vmax.f32 %v2619_v48, %v789_v52 }
 0x266   :  { %v875_v63 = vmul.f32 1.442695, %v857_v53  ;;  %v858_v0 = vsub.f32 %v1930_v15, %v782_v54  ;;  %v798_v1 = vmax.f32 %v796_v46, %v797_v55  ;;  %v803_v3 = vrot.slane %v802_v56, 2 }
 0x267   :  { %v871_v4 = vmul.f32 1.442695, %v855_v57  ;;  %v856_v62 = vsub.f32 %v699_v18, %v770_v58  ;;  %v786_v5 = vmax.f32 %v784_v51, %v785_v59  ;;  %v791_v6 = vrot.slane %v790_v61, 2  ;;  %v2625_v7 = vpop.f32.mrb[12].mxu0 }
 0x268   :  { %2113 = vpow2.f32 %v875_v63  ;;  %v877_v8 = vmul.f32 1.442695, %v858_v0  ;;  %v799_v9 = vrot.slane %v798_v1, 1  ;;  %v804_v10 = vmax.f32 %v802_v56, %v803_v3  ;;  %v2627_v11 = vpop.f32.mrb[13].mxu0 }
 0x269   :  { %2115 = vpow2.f32 %v871_v4  ;;  %v873_v12 = vmul.f32 1.442695, %v856_v62  ;;  %v787_v13 = vrot.slane %v786_v5, 1  ;;  %v792_v14 = vmax.f32 %v790_v61, %v791_v6  ;;  %v2629_v16 = vpop.f32.mrb[14].mxu0 }
 0x26a   :  { %2117 = vpow2.f32 %v877_v8  ;;  %v800_v15 = vmax.f32 %v798_v1, %v799_v9  ;;  %v805_v17 = vrot.slane %v804_v10, 1  ;;  %v819_v18 = vrot.slane %v2625_v7, 4  ;;  %v2632_v19 = vpop.f32.mrb[15].mxu0 }
 0x26b   :  { %2119 = vpow2.f32 %v873_v12  ;;  %v788_v20 = vmax.f32 %v786_v5, %v787_v13  ;;  %v793_v21 = vrot.slane %v792_v14, 1  ;;  %v807_v22 = vrot.slane %v2627_v11, 4 }
 0x26c   :  { %v861_v23 = vsub.f32 %v2608_v30, %v800_v15  ;;  %v806_v24 = vmax.f32 %v804_v10, %v805_v17  ;;  %v820_v25 = vmax.f32 %v2625_v7, %v819_v18  ;;  %v825_v26 = vrot.slane %v2629_v16, 4 }
 0x26d   :  { %v859_v27 = vsub.f32 %v2611_v34, %v788_v20  ;;  %v794_v29 = vmax.f32 %v792_v14, %v793_v21  ;;  %v808_v31 = vmax.f32 %v2627_v11, %v807_v22  ;;  %v813_v32 = vrot.slane %v2632_v19, 4 }
 0x26e   :  { %v883_v33 = vmul.f32 1.442695, %v861_v23  ;;  %v862_v35 = vsub.f32 %v2614_v39, %v806_v24  ;;  %v821_v36 = vrot.slane %v820_v25, 2  ;;  %v826_v37 = vmax.f32 %v2629_v16, %v825_v26 }
 0x26f   :  { %v879_v43 = vmul.f32 1.442695, %v859_v27  ;;  %v860_v30 = vsub.f32 %v2619_v48, %v794_v29  ;;  %v809_v44 = vrot.slane %v808_v31, 2  ;;  %v814_v46 = vmax.f32 %v2632_v19, %v813_v32  ;;  %v2645_v47 = vpop.f32.mrb[16].mxu0 }
 0x270   :  { %v885_v34 = vmul.f32 1.442695, %v862_v35  ;;  %v822_v49 = vmax.f32 %v820_v25, %v821_v36  ;;  %v827_v50 = vrot.slane %v826_v37, 2  ;;  %v2647_v51 = vpop.f32.mrb[17].mxu0  ;;  %2121 = vpow2.f32 %v883_v33 }
 0x271   :  { %v810_v52 = vmax.f32 %v808_v31, %v809_v44  ;;  %v815_v53 = vrot.slane %v814_v46, 2  ;;  %v178_v39 = vrot.slane %v2569_v42, %v177_v40  ;;  %v2652_v54 = vpop.f32.mrb[18].mxu0  ;;  %2123 = vpow2.f32 %v879_v43 }
 0x272   :  { %v2654_v48 = vpop.eup %2113  ;;  %v881_v55 = vmul.f32 1.442695, %v860_v30  ;;  %v823_v56 = vrot.slane %v822_v49, 1  ;;  %v828_v57 = vmax.f32 %v826_v37, %v827_v50  ;;  %v2656_v58 = vpop.f32.mrb[19].mxu0  ;;  %2125 = vpow2.f32 %v885_v34 }
 0x273   :  { %v2116_v59 = vpop.eup %2115  ;;  %v915_v61 = vrot.slane %v2654_v48, 4  ;;  %v811_v63 = vrot.slane %v810_v52, 1  ;;  %v816_v0 = vmax.f32 %v814_v46, %v815_v53  ;;  %v843_v62 = vrot.slane %v2645_v47, 4 }
 0x274   :  { %v2659_v1 = vpop.eup %2117  ;;  %v903_v3 = vrot.slane %v2116_v59, 4  ;;  %v824_v42 = vmax.f32 %v822_v49, %v823_v56  ;;  %v829_v4 = vrot.slane %v828_v57, 1  ;;  %2127 = vpow2.f32 %v881_v55 }
 0x275   :  { %v2120_v5 = vpop.eup %2119  ;;  %v916_v6 = vadd.f32 %v2654_v48, %v915_v61  ;;  %v921_v8 = vrot.slane %v2659_v1, 4  ;;  %v812_v9 = vmax.f32 %v810_v52, %v811_v63  ;;  %v817_v10 = vrot.slane %v816_v0, 1 }
 0x276   :  { %v904_v12 = vadd.f32 %v2116_v59, %v903_v3  ;;  %v909_v13 = vrot.slane %v2120_v5, 4  ;;  %v865_v14 = vsub.f32 %v2625_v7, %v824_v42  ;;  %v830_v15 = vmax.f32 %v828_v57, %v829_v4 }
 0x277   :  { %v917_v17 = vrot.slane %v916_v6, 2  ;;  %v922_v18 = vadd.f32 %v2659_v1, %v921_v8  ;;  %v863_v20 = vsub.f32 %v2627_v11, %v812_v9  ;;  %v818_v29 = vmax.f32 %v816_v0, %v817_v10 }
 0x278   :  { %v905_v21 = vrot.slane %v904_v12, 2  ;;  %v910_v22 = vadd.f32 %v2120_v5, %v909_v13  ;;  %v891_v23 = vmul.f32 1.442695, %v865_v14  ;;  %v866_v24 = vsub.f32 %v2629_v16, %v830_v15 }
 0x279   :  { %v918_v25 = vadd.f32 %v917_v17, %v916_v6  ;;  %v923_v26 = vrot.slane %v922_v18, 2  ;;  %v887_v27 = vmul.f32 1.442695, %v863_v20  ;;  %v864_v16 = vsub.f32 %v2632_v19, %v818_v29 }
 0x27a   :  { %v906_v31 = vadd.f32 %v905_v21, %v904_v12  ;;  %2129 = vpow2.f32 %v891_v23  ;;  %v893_v32 = vmul.f32 1.442695, %v866_v24  ;;  %v2668_v7 = vpop.eup %2121  ;;  %v911_v33 = vrot.slane %v910_v22, 2 }
 0x27b   :  { %2131 = vpow2.f32 %v887_v27  ;;  %v2670_v35 = vpop.eup %2123  ;;  %v919_v36 = vrot.slane %v918_v25, 1  ;;  %v924_v37 = vadd.f32 %v923_v26, %v922_v18  ;;  %v844_v43 = vmax.f32 %v2645_v47, %v843_v62 }
 0x27c   :  { %2133 = vpow2.f32 %v893_v32  ;;  %v2672_v11 = vpop.eup %2125  ;;  %v2677_v30 = vadd.f32 %v2596_v60, %v178_v39  ;;  %v907_v44 = vrot.slane %v906_v31, 1  ;;  %v939_v46 = vrot.slane %v2668_v7, 4 }
 0x27d   :  { %v912_v34 = vadd.f32 %v911_v33, %v910_v22  ;;  %v920_v49 = vadd.f32 %v919_v36, %v918_v25  ;;  %v927_v50 = vrot.slane %v2670_v35, 4  ;;  %v2682_v52 = vadd.f32 %v2598_v2, %v178_v39 }
 0x27e   :  { %v2684_v53 = vpop.eup %2127  ;;  %v925_v55 = vrot.slane %v924_v37, 1  ;;  %v889_v56 = vmul.f32 1.442695, %v864_v16  ;;  %v845_v19 = vrot.slane %v844_v43, 2  ;;  %v2687_v57 = vmul.f32 %v2116_v59, %v2677_v30 }
 0x27f   :  { %v908_v60 = vadd.f32 %v907_v44, %v906_v31  ;;  %v2690_v61 = vadd.f32 %v2668_v7, %v939_v46  ;;  %v945_v63 = vrot.slane %v2672_v11, 4  ;;  %v2694_v0 = vmul.f32 %v2120_v5, %v2677_v30 }
 0x280   :  { %v913_v3 = vrot.slane %v912_v34, 1  ;;  %2135 = vpow2.f32 %v889_v56  ;;  %v846_v2 = vmax.f32 %v844_v43, %v845_v19  ;;  %v2698_v39 = vmul.f32 %v2654_v48, %v2677_v30 }
 0x281   :  { %2137 = vrcp.f32 %v920_v49  ;;  %v928_v59 = vadd.f32 %v2670_v35, %v927_v50  ;;  %v933_v4 = vrot.slane %v2684_v53, 4  ;;  %v831_v62 = vrot.slane %v2647_v51, 4 }
 0x282   :  { %v847_v9 = vrot.slane %v846_v2, 1  ;;  %v849_v5 = vrot.slane %v2652_v54, 4  ;;  %v837_v10 = vrot.slane %v2656_v58, 4  ;;  %v926_v22 = vadd.f32 %v925_v55, %v924_v37 }
 0x283   :  { %v832_v48 = vmax.f32 %v2647_v51, %v831_v62  ;;  %v929_v26 = vrot.slane %v928_v59, 2  ;;  %v941_v32 = vrot.slane %v2690_v61, 2  ;;  %v934_v43 = vadd.f32 %v2684_v53, %v933_v4 }
 0x284   :  { %v2130_v42 = vpop.eup %2129  ;;  %v848_v20 = vmax.f32 %v846_v2, %v847_v9  ;;  %v850_v21 = vmax.f32 %v2652_v54, %v849_v5  ;;  %v838_v25 = vmax.f32 %v2656_v58, %v837_v10  ;;  %2139 = vrcp.f32 %v908_v60 }
 0x285   :  { %v2132_v6 = vpop.eup %2131  ;;  %v963_v8 = vrot.slane %v2130_v42, 4  ;;  %v2712_v15 = vmul.f32 %v2130_v42, %v2682_v52  ;;  %v833_v24 = vrot.slane %v832_v48, 2  ;;  %v914_v49 = vadd.f32 %v913_v3, %v912_v34 }
 0x286   :  { %v2705_v12 = vpop.eup %2133  ;;  %v951_v13 = vrot.slane %v2132_v6, 4  ;;  %v2709_v14 = vmul.f32 %v2132_v6, %v2682_v52  ;;  %v869_v29 = vsub.f32 %v2645_v47, %v848_v20  ;;  %v851_v31 = vrot.slane %v850_v21, 2 }
 0x287   :  { %v964_v17 = vadd.f32 %v2130_v42, %v963_v8  ;;  %v969_v18 = vrot.slane %v2705_v12, 4  ;;  %v834_v36 = vmax.f32 %v832_v48, %v833_v24  ;;  %v839_v16 = vrot.slane %v838_v25, 2 }
 0x288   :  { %v952_v23 = vadd.f32 %v2132_v6, %v951_v13  ;;  %v899_v46 = vmul.f32 1.442695, %v869_v29  ;;  %v852_v37 = vmax.f32 %v850_v21, %v851_v31  ;;  %v930_v19 = vadd.f32 %v929_v26, %v928_v59 }
 0x289   :  { %v965_v27 = vrot.slane %v964_v17, 2  ;;  %v970_v33 = vadd.f32 %v2705_v12, %v969_v18  ;;  %v835_v50 = vrot.slane %v834_v36, 1  ;;  %v840_v55 = vmax.f32 %v838_v25, %v839_v16 }
 0x28a   :  { %v953_v44 = vrot.slane %v952_v23, 2  ;;  %v2136_v56 = vpop.eup %2135  ;;  %2141 = vpow2.f32 %v899_v46  ;;  %v853_v47 = vrot.slane %v852_v37, 1  ;;  %v935_v5 = vrot.slane %v934_v43, 2 }
 0x28b   :  { %v966_v2 = vadd.f32 %v965_v27, %v964_v17  ;;  %v2721_v42 = vpop.eup %2137  ;;  %v971_v62 = vrot.slane %v970_v33, 2  ;;  %v957_v6 = vrot.slane %v2136_v56, 4  ;;  %v836_v8 = vmax.f32 %v834_v36, %v835_v50 }
 0x28c   :  { %v841_v9 = vrot.slane %v840_v55, 1  ;;  %v954_v4 = vadd.f32 %v953_v44, %v952_v23  ;;  %v854_v10 = vmax.f32 %v852_v37, %v853_v47  ;;  %v2724_v13 = vmul.f32 %v2136_v56, %v2682_v52 }
 0x28d   :  { %2143 = vrcp.f32 %v926_v22  ;;  %v958_v34 = vadd.f32 %v2136_v56, %v957_v6  ;;  %v867_v60 = vsub.f32 %v2647_v51, %v836_v8  ;;  %v946_v59 = vadd.f32 %v2672_v11, %v945_v63 }
 0x28e   :  { %v842_v3 = vmax.f32 %v840_v55, %v841_v9  ;;  %2145 = vrcp.f32 %v914_v49  ;;  %v1015_v48 = vrot.slane %v2687_v57, 4  ;;  %v870_v17 = vsub.f32 %v2652_v54, %v854_v10 }
 0x28f   :  { %v967_v18 = vrot.slane %v966_v2, 1  ;;  %v972_v20 = vadd.f32 %v971_v62, %v970_v33  ;;  %v895_v21 = vmul.f32 1.442695, %v867_v60  ;;  %v931_v24 = vrot.slane %v930_v19, 1 }
 0x290   :  { %v868_v23 = vsub.f32 %v2656_v58, %v842_v3  ;;  %v2733_v22 = vadd.f32 %v935_v5, %v934_v43  ;;  %v955_v25 = vrot.slane %v954_v4, 1  ;;  %v901_v51 = vmul.f32 1.442695, %v870_v17  ;;  %v2741_v58 = vpop.eup %2139 }
 0x291   :  { %v959_v26 = vrot.slane %v958_v34, 2  ;;  %v1021_v27 = vrot.slane %v2694_v0, 4  ;;  %2147 = vpow2.f32 %v895_v21  ;;  %v1063_v63 = vrot.slane %v2709_v14, 4 }
 0x292   :  { %v897_v29 = vmul.f32 1.442695, %v868_v23  ;;  %2149 = vpow2.f32 %v901_v51  ;;  %v1002_v54 = vmul.f32 %v2659_v1, %v2677_v30  ;;  %v1003_v31 = vmul.f32 %v2670_v35, %v2677_v30 }
 0x293   :  { %v968_v33 = vadd.f32 %v967_v18, %v966_v2  ;;  %v973_v36 = vrot.slane %v972_v20, 1  ;;  %v1004_v16 = vmul.f32 %v2684_v53, %v2677_v30  ;;  %v956_v44 = vadd.f32 %v955_v25, %v954_v4 }
 0x294   :  { %2151 = vpow2.f32 %v897_v29  ;;  %v2142_v43 = vpop.eup %2141  ;;  %v1005_v46 = vmul.f32 %v2668_v7, %v2677_v30  ;;  %v2749_v37 = vmul.f32 %v2672_v11, %v2677_v30  ;;  %v2753_v1 = vmul.f32 %v2705_v12, %v2682_v52 }
 0x295   :  { %v960_v35 = vadd.f32 %v959_v26, %v958_v34  ;;  %v987_v49 = vrot.slane %v2142_v43, 4  ;;  %v942_v50 = vadd.f32 %v941_v32, %v2690_v61  ;;  %v2757_v55 = vmul.f32 %v2142_v43, %v2682_v52 }
 0x296   :  { %v1016_v53 = vadd.f32 %v1015_v48, %v2687_v57  ;;  %v1022_v56 = vadd.f32 %v1021_v27, %v2694_v0  ;;  %v1027_v7 = vrot.slane %v2698_v39, 4  ;;  %v1033_v2 = vrot.slane %v1002_v54, 4 }
 0x297   :  { %v2762_v11 = vpop.eup %2143  ;;  %v988_v30 = vadd.f32 %v2142_v43, %v987_v49  ;;  %v2764_v47 = vadd.f32 %v931_v24, %v930_v19  ;;  %v947_v12 = vrot.slane %v946_v59, 2  ;;  %v1039_v62 = vrot.slane %v1003_v31, 4 }
 0x298   :  { %v2766_v6 = vpop.eup %2145  ;;  %2153 = vrcp.f32 %v968_v33  ;;  %v937_v61 = vrot.slane %v2733_v22, 1  ;;  %v1017_v32 = vrot.slane %v1016_v53, 2  ;;  %v1023_v8 = vrot.slane %v1022_v56, 2 }
 0x299   :  { %v974_v57 = vadd.f32 %v973_v36, %v972_v20  ;;  %v989_v9 = vrot.slane %v988_v30, 2  ;;  %v1069_v0 = vrot.slane %v2724_v13, 4  ;;  %v1028_v5 = vadd.f32 %v1027_v7, %v2698_v39 }
 0x29a   :  { %2155 = vrcp.f32 %v956_v44  ;;  %v961_v4 = vrot.slane %v960_v35, 1  ;;  %v943_v10 = vrot.slane %v942_v50, 1  ;;  %v1034_v19 = vadd.f32 %v1033_v2, %v1002_v54 }
 0x29b   :  { %v2148_v34 = vpop.eup %2147  ;;  %v948_v60 = vadd.f32 %v947_v12, %v946_v59  ;;  %v1040_v3 = vadd.f32 %v1039_v62, %v1003_v31  ;;  %v1045_v48 = vrot.slane %v1004_v16, 4  ;;  %v1051_v17 = vrot.slane %v1005_v46, 4 }
 0x29c   :  { %v2150_v18 = vpop.eup %2149  ;;  %v975_v21 = vrot.slane %v2148_v34, 4  ;;  %v2772_v23 = vmul.f32 %v2148_v34, %v2682_v52  ;;  %v1018_v20 = vadd.f32 %v1017_v32, %v1016_v53  ;;  %v1024_v24 = vadd.f32 %v1023_v8, %v1022_v56 }
 0x29d   :  { %v993_v51 = vrot.slane %v2150_v18, 4  ;;  %v990_v26 = vadd.f32 %v989_v9, %v988_v30  ;;  %v2775_v39 = vmul.f32 %v2150_v18, %v2682_v52  ;;  %v1029_v27 = vrot.slane %v1028_v5, 2 }
 0x29e   :  { %v2152_v25 = vpop.eup %2151  ;;  %v976_v29 = vadd.f32 %v2148_v34, %v975_v21  ;;  %v1035_v31 = vrot.slane %v1034_v19, 2  ;;  %2157 = vrcp.f32 %v974_v57  ;;  %v1041_v36 = vrot.slane %v1040_v3, 2 }
 0x29f   :  { %v981_v54 = vrot.slane %v2152_v25, 4  ;;  %v2778_v59 = vmul.f32 %v2152_v25, %v2682_v52  ;;  %v994_v33 = vadd.f32 %v2150_v18, %v993_v51  ;;  %v1046_v43 = vadd.f32 %v1045_v48, %v1004_v16 }
 0x2a0   :  { %v962_v44 = vadd.f32 %v961_v4, %v960_v35  ;;  %v949_v49 = vrot.slane %v948_v60, 1  ;;  %v1019_v53 = vrot.slane %v1018_v20, 1  ;;  %v1052_v56 = vadd.f32 %v1051_v17, %v1005_v46 }
 0x2a1   :  { %v977_v7 = vrot.slane %v976_v29, 2  ;;  %v982_v2 = vadd.f32 %v2152_v25, %v981_v54  ;;  %v991_v30 = vrot.slane %v990_v26, 1  ;;  %v1030_v12 = vadd.f32 %v1029_v27, %v1028_v5 }
 0x2a2   :  { %v2780_v62 = vpop.eup %2153  ;;  %v2783_v32 = vadd.f32 %v937_v61, %v2733_v22  ;;  %v2785_v52 = vadd.f32 %v943_v10, %v942_v50  ;;  %v1025_v8 = vrot.slane %v1024_v24, 1  ;;  %v1036_v57 = vadd.f32 %v1035_v31, %v1034_v19 }
 0x2a3   :  { %v995_v9 = vrot.slane %v994_v33, 2  ;;  %v1042_v34 = vadd.f32 %v1041_v36, %v1040_v3  ;;  %v1047_v16 = vrot.slane %v1046_v43, 2  ;;  %v1057_v35 = vrot.slane %v2749_v37, 4 }
 0x2a4   :  { %v2788_v4 = vpop.eup %2155  ;;  %2159 = vrcp.f32 %v962_v44  ;;  %v2790_v46 = vadd.f32 %v949_v49, %v948_v60  ;;  %v1020_v5 = vadd.f32 %v1019_v53, %v1018_v20  ;;  %v1053_v48 = vrot.slane %v1052_v56, 2 }
 0x2a5   :  { %v978_v17 = vadd.f32 %v977_v7, %v976_v29  ;;  %v983_v18 = vrot.slane %v982_v2, 2  ;;  %v2792_v22 = vadd.f32 %v991_v30, %v990_v26  ;;  %v1031_v50 = vrot.slane %v1030_v12, 1 }
 0x2a6   :  { %v1026_v61 = vadd.f32 %v1025_v8, %v1024_v24  ;;  %v1037_v10 = vrot.slane %v1036_v57, 1  ;;  %v1064_v19 = vadd.f32 %v1063_v63, %v2709_v14  ;;  %v1070_v3 = vadd.f32 %v1069_v0, %v2724_v13 }
 0x2a7   :  { %v996_v21 = vadd.f32 %v995_v9, %v994_v33  ;;  %v1043_v25 = vrot.slane %v1042_v34, 1  ;;  %v2798_v51 = vadd.f32 %v1047_v16, %v1046_v43  ;;  %v1058_v60 = vadd.f32 %v1057_v35, %v2749_v37 }
 0x2a8   :  { %v2801_v20 = vadd.f32 %v1053_v48, %v1052_v56  ;;  %v1065_v27 = vrot.slane %v1064_v19, 2  ;;  %v1071_v26 = vrot.slane %v1070_v3, 2  ;;  %v1075_v29 = vrot.slane %v2712_v15, 4  ;;  %v2158_v24 = vpop.eup %2157 }
 0x2a9   :  { %v979_v54 = vrot.slane %v978_v17, 1  ;;  %v984_v31 = vadd.f32 %v983_v18, %v982_v2  ;;  %v1032_v36 = vadd.f32 %v1031_v50, %v1030_v12  ;;  %v1081_v14 = vrot.slane %v2753_v1, 4 }
 0x2aa   :  { %v1038_v63 = vadd.f32 %v1037_v10, %v1036_v57  ;;  %v1066_v13 = vadd.f32 %v1065_v27, %v1064_v19  ;;  %v1072_v0 = vadd.f32 %v1071_v26, %v1070_v3  ;;  %v1076_v33 = vadd.f32 %v1075_v29, %v2712_v15 }
 0x2ab   :  { %v997_v43 = vrot.slane %v996_v21, 1  ;;  %v2806_v44 = vadd.f32 %v1043_v25, %v1042_v34  ;;  %v1059_v37 = vrot.slane %v1058_v60, 2  ;;  %v1082_v49 = vadd.f32 %v1081_v14, %v2753_v1 }
 0x2ac   :  { %v1049_v53 = vrot.slane %v2798_v51, 1  ;;  %v1055_v56 = vrot.slane %v2801_v20, 1  ;;  %v1077_v7 = vrot.slane %v1076_v33, 2  ;;  %v1087_v2 = vrot.slane %v2772_v23, 4 }
 0x2ad   :  { %v985_v30 = vrot.slane %v984_v31, 1  ;;  %v1083_v12 = vrot.slane %v1082_v49, 2  ;;  %v1093_v8 = vrot.slane %v2778_v59, 4  ;;  %v1099_v57 = vrot.slane %v2757_v55, 4 }
 0x2ae   :  { %v2160_v15 = vpop.eup %2159  ;;  %v980_v9 = vadd.f32 %v979_v54, %v978_v17  ;;  %v1067_v34 = vrot.slane %v1066_v13, 1  ;;  %v1073_v16 = vrot.slane %v1072_v0, 1  ;;  %v1078_v35 = vadd.f32 %v1077_v7, %v1076_v33 }
 0x2af   :  { %v998_v48 = vadd.f32 %v997_v43, %v996_v21  ;;  %v2814_v1 = vadd.f32 %v1059_v37, %v1058_v60  ;;  %v1084_v18 = vadd.f32 %v1083_v12, %v1082_v49  ;;  %v1105_v50 = vrot.slane %v2775_v39, 4 }
 0x2b0   :  { %v1079_v10 = vrot.slane %v1078_v35, 1  ;;  %v1088_v19 = vadd.f32 %v1087_v2, %v2772_v23  ;;  %v1112_v3 = vmul.f32 %v2741_v58, %v1020_v5  ;;  %v1114_v25 = vmul.f32 %v2766_v6, %v1026_v61 }
 0x2b1   :  { %v986_v27 = vadd.f32 %v985_v30, %v984_v31  ;;  %v1085_v26 = vrot.slane %v1084_v18, 1  ;;  %v1094_v17 = vadd.f32 %v1093_v8, %v2778_v59  ;;  %v1100_v29 = vadd.f32 %v1099_v57, %v2757_v55 }
 0x2b2   :  { %v1068_v21 = vadd.f32 %v1067_v34, %v1066_v13  ;;  %v1074_v60 = vadd.f32 %v1073_v16, %v1072_v0  ;;  %v1116_v54 = vmul.f32 %v2721_v42, %v1032_v36  ;;  %v1118_v14 = vmul.f32 %v2762_v11, %v1038_v63 }
 0x2b3   :  { %v1061_v23 = vrot.slane %v2814_v1, 1  ;;  %v1080_v33 = vadd.f32 %v1079_v10, %v1078_v35  ;;  %v1086_v58 = vadd.f32 %v1085_v26, %v1084_v18  ;;  %v1106_v6 = vadd.f32 %v1105_v50, %v2775_v39 }
 0x2b4   :  { %v1089_v5 = vrot.slane %v1088_v19, 2  ;;  %2161 = vrcp.f32 %v2764_v47  ;;  %v1128_v55 = vmul.f32 %v2788_v4, %v1068_v21  ;;  %v1130_v59 = vmul.f32 %v2160_v15, %v1074_v60 }
 0x2b5   :  { %v1095_v61 = vrot.slane %v1094_v17, 2  ;;  %2163 = vrcp.f32 %v2783_v32  ;;  %v1132_v42 = vmul.f32 %v2780_v62, %v1080_v33  ;;  %v1134_v11 = vmul.f32 %v2158_v24, %v1086_v58 }
 0x2b6   :  { %v1101_v31 = vrot.slane %v1100_v29, 2  ;;  %2165 = vrcp.f32 %v2785_v52  ;;  %v1143_v36 = vpack.c.bf16 %v1112_v3, %v1112_v3  ;;  %v1144_v63 = vpack.c.bf16 %v1114_v25, %v1114_v25 }
 0x2b7   :  { %v1107_v13 = vrot.slane %v1106_v6, 2  ;;  %2167 = vrcp.f32 %v2790_v46  ;;  %v1145_v39 = vpack.c.bf16 %v1116_v54, %v1116_v54  ;;  %v1151_v0 = vpack.c.bf16 %v1128_v55, %v1128_v55 }
 0x2b8   :  { %2169 = vrcp.f32 %v980_v9  ;;  %v1146_v47 = vpack.c.bf16 %v1118_v14, %v1118_v14  ;;  %v1152_v4 = vpack.c.bf16 %v1130_v59, %v1130_v59  ;;  %v1153_v43 = vpack.c.bf16 %v1132_v42, %v1132_v42 }
 0x2b9   :  { %v1090_v37 = vadd.f32 %v1089_v5, %v1088_v19  ;;  %2171 = vrcp.f32 %v986_v27  ;;  %v1154_v32 = vpack.c.bf16 %v1134_v11, %v1134_v11  ;;  %v1196_v49 = vunpack.c.l.b16 %v1144_v63 }
 0x2ba   :  { %v1096_v62 = vadd.f32 %v1095_v61, %v1094_v17  ;;  %v1102_v24 = vadd.f32 %v1101_v31, %v1100_v29  ;;  %2173 = vrcp.f32 %v2792_v22  ;;  %v1195_v52 = vunpack.c.l.b16 %v1143_v36 }
 0x2bb   :  { %2175 = vrcp.f32 %v998_v48  ;;  %v1197_v7 = vunpack.c.l.b16 %v1145_v39  ;;  %v1203_v2 = vunpack.c.l.b16 %v1151_v0  ;;  %v1204_v46 = vunpack.c.l.b16 %v1152_v4 }
 0x2bc   :  { %v1108_v30 = vadd.f32 %v1107_v13, %v1106_v6  ;;  %v1198_v12 = vunpack.c.l.b16 %v1146_v47  ;;  %v1205_v8 = vunpack.c.l.b16 %v1153_v43  ;;  %v1212_v57 = vsel %vm1211_vm1, %v1196_v49, %v1195_v52 }
 0x2bd   :  { %v1091_v15 = vrot.slane %v1090_v37, 1  ;;  %v1206_v9 = vunpack.c.l.b16 %v1154_v32  ;;  %v1214_v34 = vsel %vm1213_vm2, %v1197_v7, %v1212_v57  ;;  %v1225_v16 = vsel %vm1211_vm1, %v1204_v46, %v1203_v2  ;;  %v2860_v57 = vld [vmem:[%s2925_s8] sm:$0xff]  ;;  %s2390_s8 = smov [#allocation14]  }
 0x2be   :  { %v2162_v35 = vpop.eup %2161  ;;  %v1050_v22 = vadd.f32 %v1049_v53, %v2798_v51  ;;  %v1097_v48 = vrot.slane %v1096_v62, 1  ;;  %v1216_v18 = vsel %vm1215_vm3, %v1198_v12, %v1214_v34  ;;  %v1226_v50 = vsel %vm1213_vm2, %v1205_v8, %v1225_v16  ;;  %s1754_s0 = sshll.u32 %s2390_s8, 4  ;;  %s1755_s0 = int_to_ptr.vmem [resolvable:$true] %s1754_s0 }
 0x2bf   :  { %v2164_v10 = vpop.eup %2163  ;;  %v1056_v19 = vadd.f32 %v1055_v56, %v2801_v20  ;;  %v1103_v3 = vrot.slane %v1102_v24, 1  ;;  %v1120_v25 = vmul.f32 %v2162_v35, %v2806_v44  ;;  %v1227_v27 = vsel %vm1215_vm3, %v1206_v9, %v1226_v50  ;;  %s2341_s28 = scalar_lea.vmem %s1755_s0, 32  ;;  %p2346_p1 = scmp.lt.s32.totalorder %s1755_s0, %s1755_s0 }
 0x2c0   :  { %v2166_v26 = vpop.eup %2165  ;;  %v1062_v17 = vadd.f32 %v1061_v23, %v2814_v1  ;;  %v1109_v29 = vrot.slane %v1108_v30, 1  ;;  %v1122_v51 = vmul.f32 %v2164_v10, %v1050_v22  ;;  %v1092_v21 = vadd.f32 %v1091_v15, %v1090_v37  ;;  %v2186_v10 = vld [vmem:[#allocation2 + $0x8] sm:$0xff]  ;;  %p2342_p0 = scmp.ne.s32.totalorder %s1755_s0, %s2341_s28  ;;  %p2347_p2 = scmp.lt.s32.totalorder %s2341_s28, %s2341_s28 }
 0x2c1   :  { %v2168_v53 = vpop.eup %2167  ;;  %v1124_v60 = vmul.f32 %v2166_v26, %v1056_v19  ;;  %v1147_v54 = vpack.c.bf16 %v1120_v25, %v1120_v25  ;;  %v1098_v33 = vadd.f32 %v1097_v48, %v1096_v62  ;;  %v1104_v44 = vadd.f32 %v1103_v3, %v1102_v24  ;;  %v2089_v3 = vld [vmem:[#allocation10] sm:$0xff]   ;;  %v2090_v25 = vld [vmem:[#allocation10 + $0x8] sm:$0xff]  }
 0x2c2   :  { %v2170_v14 = vpop.eup %2169  ;;  %v1126_v58 = vmul.f32 %v2168_v53, %v1062_v17  ;;  %v1148_v20 = vpack.c.bf16 %v1122_v51, %v1122_v51  ;;  %v1110_v1 = vadd.f32 %v1109_v29, %v1108_v30  ;;  %v1178_v15 = vrot.slane %v2860_v57, %v2564_v41  ;;  %1964 = vmatpush3.bf16.msra.mxu0 %v2089_v3  ;;  %p2348_p3 = por %p2347_p2, %p2346_p1 }
 0x2c3   :  { %v2172_v56 = vpop.eup %2171  ;;  %v1136_v6 = vmul.f32 %v2170_v14, %v1092_v21  ;;  %v1149_v5 = vpack.c.bf16 %v1124_v60, %v1124_v60  ;;  %v1199_v55 = vunpack.c.l.b16 %v1147_v54  ;;  %1965 = vmatprep.subr.bf16.mxu0 %v2387_v28  ;;  %v2091_v60 = vld [vmem:[#allocation10 + $0x10] sm:$0xff]   ;;  %v2092_v54 = vld [vmem:[#allocation10 + $0x18] sm:$0xff]   ;;  %v2093_v14 = vld [vmem:[#allocation10 + $0x20] sm:$0xff]  }
 0x2c4   :  { %v2174_v59 = vpop.eup %2173  ;;  %v1138_v23 = vmul.f32 %v2172_v56, %v1098_v33  ;;  %v1150_v61 = vpack.c.bf16 %v1126_v58, %v1126_v58  ;;  %v1200_v42 = vunpack.c.l.b16 %v1148_v20  ;;  %v2094_v33 = vld [vmem:[#allocation10 + $0x28] sm:$0xff]   ;;  %v2097_v58 = vld [vmem:[#allocation11] sm:$0xff]   ;;  %v2095_v56 = vld [vmem:[#allocation10 + $0x30] sm:$0xff]   ;;  %p2349_p4 = pnand %p2348_p3, %p2342_p0 }
 0x2c5   :  { %v2176_v11 = vpop.eup %2175  ;;  %v1140_v31 = vmul.f32 %v2174_v59, %v1104_v44  ;;  %v1155_v36 = vpack.c.bf16 %v1136_v6, %v1136_v6  ;;  %v1201_v63 = vunpack.c.l.b16 %v1149_v5  ;;  %v1218_v13 = vsel %vm1217_vm4, %v1199_v55, %v1216_v18  ;;  %v2185_v18 = vld [vmem:[#allocation2] sm:$0xff]  ;;  %v2098_v20 = vld [vmem:[#allocation11 + $0x8] sm:$0xff]   ;;  %v2096_v6 = vld [vmem:[#allocation10 + $0x38] sm:$0xff]  }
 0x2c6   :  { %v1142_v39 = vmul.f32 %v2176_v11, %v1110_v1  ;;  %v1156_v0 = vpack.c.bf16 %v1138_v23, %v1138_v23  ;;  %v1202_v47 = vunpack.c.l.b16 %v1150_v61  ;;  %v1220_v4 = vsel %vm1219_vm5, %v1200_v42, %v1218_v13  ;;  %1966 = vmatpush3.bf16.msra.mxu0 %v2090_v25  ;;  %v2099_v44 = vld [vmem:[#allocation11 + $0x10] sm:$0xff]   ;;  %v2100_v5 = vld [vmem:[#allocation11 + $0x18] sm:$0xff]   ;;  %v2101_v55 = vld [vmem:[#allocation11 + $0x20] sm:$0xff]  }
 0x2c7   :  { %v1157_v43 = vpack.c.bf16 %v1140_v31, %v1140_v31  ;;  %v1207_v37 = vunpack.c.l.b16 %v1155_v36  ;;  %v1222_v32 = vsel %vm1221_vm6, %v1201_v63, %v1220_v4  ;;  %1967 = vmatprep.subr.bf16.mxu0 %v2387_v28  ;;  %v2102_v59 = vld [vmem:[#allocation11 + $0x28] sm:$0xff]   ;;  %v1351_v36 = vrot.slane %v2860_v57, %v173_v45  ;;  %v2104_v45 = vld [vmem:[#allocation11 + $0x38] sm:$0xff]  }
 0x2c8   :  { %v1158_v49 = vpack.c.bf16 %v1142_v39, %v1142_v39  ;;  %v1208_v62 = vunpack.c.l.b16 %v1156_v0  ;;  %v1224_v24 = vsel %vm1223_vm7, %v1202_v47, %v1222_v32  ;;  %v1357_v13 = vrot.slane %v2860_v57, %v177_v40 }
 0x2c9   :  { %v1209_v52 = vunpack.c.l.b16 %v1157_v43  ;;  %v1228_v7 = vsel %vm1217_vm4, %v1207_v37, %v1227_v27  ;;  %v1379_v40 = vsub.s32 3, %v2561_v38 }
 0x2ca   :  { %v1210_v2 = vunpack.c.l.b16 %v1158_v49  ;;  %v1229_v46 = vsel %vm1219_vm5, %v1208_v62, %v1228_v7  ;;  %1968 = vmatpush3.bf16.msra.mxu0 %v2091_v60  ;;  %v2103_v62 = vld [vmem:[#allocation11 + $0x30] sm:$0xff]   ;;  %v2106_v60 = vld [vmem:[#allocation13 + $0x8] sm:$0xff]  }
 0x2cb   :  { %v1230_v30 = vsel %vm1221_vm6, %v1209_v52, %v1229_v46  ;;  %1969 = vmatprep.subr.bf16.mxu0 %v2387_v28 }
 0x2cc   :  { %v1231_v12 = vsel %vm1223_vm7, %v1210_v2, %v1230_v30 }
 0x2cd   :  { %v1232_v8 = vpack.c.b16 %v1231_v12, %v1224_v24  ;;  %v1380_v24 = vrot.slane %v2860_v57, %v1379_v40 }
 0x2ce   :  { %1970 = vmatpush3.bf16.msra.mxu0 %v2092_v54  ;;  %v2107_v54 = vld [vmem:[#allocation13 + $0x10] sm:$0xff]  }
 0x2cf   :  { %1960 = vmatmul.mubr.bf16.vlgmr.msra.gmra.mrb[4].mxu1 %v1232_v8  ;;  %1971 = vmatprep.subr.bf16.mxu0 %v2387_v28 }
 0x2d0   :  { %1999 = vmatprep.mubr.msk.bf16.mxu1 %vm2388_vm0, %v2387_v28  ;;  %1984 = vmatpush3.bf16.msra.mxu1 %v2097_v58  ;;  %v2110_v58 = vld [vmem:[#allocation13 + $0x28] sm:$0xff]  }
 0x2d1   :  { %1985 = vmatprep.subr.bf16.mxu1 %v2387_v28 }
 0x2d2   :  { %1972 = vmatpush3.bf16.msra.mxu0 %v2093_v14  ;;  %v2108_v14 = vld [vmem:[#allocation13 + $0x18] sm:$0xff]  }
 0x2d3   :  { %1973 = vmatprep.subr.bf16.mxu0 %v2387_v28 }
 0x2d4   :  { %1986 = vmatpush3.bf16.msra.mxu1 %v2098_v20  ;;  %v2111_v20 = vld [vmem:[#allocation13 + $0x30] sm:$0xff]  }
 0x2d5   :  { %1987 = vmatprep.subr.bf16.mxu1 %v2387_v28 }
 0x2d6   :  { %1974 = vmatpush3.bf16.msra.mxu0 %v2094_v33  ;;  %v2109_v33 = vld [vmem:[#allocation13 + $0x20] sm:$0xff]  }
 0x2d7   :  { %1975 = vmatprep.subr.bf16.mxu0 %v2387_v28 }
 0x2d8   :  { %1988 = vmatpush3.bf16.msra.mxu1 %v2099_v44 }
 0x2d9   :  { %1989 = vmatprep.subr.bf16.mxu1 %v2387_v28 }
 0x2da   :  { %1976 = vmatpush3.bf16.msra.mxu0 %v2095_v56  ;;  %v2112_v56 = vld [vmem:[#allocation13 + $0x38] sm:$0xff]  }
 0x2db   :  { %1977 = vmatprep.subr.bf16.mxu0 %v2387_v28 }
 0x2dc   :  { %1990 = vmatpush3.bf16.msra.mxu1 %v2100_v5 }
 0x2dd   :  { %1991 = vmatprep.subr.bf16.mxu1 %v2387_v28 }
 0x2de   :  { %1978 = vmatpush3.bf16.msra.mxu0 %v2096_v6 }
 0x2df   :  { %2003 = vmatprep.subr.bf16.mxu0 %v2387_v28 }
 0x2e0   :  { %1992 = vmatpush3.bf16.msra.mxu1 %v2101_v55 }
 0x2e1   :  { %1993 = vmatprep.subr.bf16.mxu1 %v2387_v28 }
 0x2e4   :  { %1994 = vmatpush3.bf16.msra.mxu1 %v2102_v59 }
 0x2e5   :  { %1995 = vmatprep.subr.bf16.mxu1 %v2387_v28 }
 0x2e8   :  { %1996 = vmatpush3.bf16.msra.mxu1 %v2103_v62 }
 0x2e9   :  { %1997 = vmatprep.subr.bf16.mxu1 %v2387_v28 }
 0x2ec   :  { %1998 = vmatpush3.bf16.msra.mxu1 %v2104_v45 }
 0x3a2   :  { %v1316_v9 = vpop.f32.mrb[4].mxu1 }
 0x3a3   :  { %v1317_v34 = vadd.f32 %v1316_v9, %v1178_v15  ;;  %v1961_v16 = vpop.f32.mrb[5].mxu1 }
 0x3a4   :  { %v1319_v35 = vpop.f32.mrb[6].mxu1 }
 0x3a5   :  { %v1320_v22 = vadd.f32 %v1319_v35, %v1178_v15  ;;  %v1962_v48 = vpop.f32.mrb[7].mxu1  ;;  %v1323_v50 = vadd.f32 %v2185_v18, %v1317_v34  ;;  %v1491_v34 = vsub.s32 4, %v2561_v38 }
 0x3a7   :  { %1325 = vadd.xlane.f32.xlu0 %v1323_v50  ;;  %v1324_v19 = vadd.f32 %v2186_v10, %v1320_v22  ;;  %v1492_v16 = vrot.slane %v2860_v57, %v1491_v34  ;;  %v1650_v34 = vsub.s32 7, %v2561_v38 }
 0x3ab   :  { %1327 = vadd.xlane.f32.xlu0 %v1324_v19 }
 0x434   :  { %v1326_v41 = vpop.xlane.xlu0 %1325 }
 0x435   :  { %v1330_v27 = vmul.f32 0.0078125, %v1326_v41 }
 0x437   :  { %v1332_v26 = vsub.f32 %v1323_v50, %v1330_v27 }
 0x438   :  { %v1328_v17 = vpop.xlane.xlu0 %1327 }
 0x439   :  { %v1331_v29 = vmul.f32 0.0078125, %v1328_v17  ;;  %v1334_v51 = vmul.f32 %v1332_v26, %v1332_v26 }
 0x43b   :  { %v1333_v53 = vsub.f32 %v1324_v19, %v1331_v29  ;;  %1336 = vadd.xlane.f32.xlu1 %v1334_v51 }
 0x43d   :  { %v1335_v21 = vmul.f32 %v1333_v53, %v1333_v53 }
 0x43f   :  { %1338 = vadd.xlane.f32.xlu1 %v1335_v21  ;;  %v2105_v21 = vld [vmem:[#allocation13] sm:$0xff]  }
 0x4c8   :  { %v1337_v1 = vpop.xlane.xlu1 %1336 }
 0x4c9   :  { %v1340_v23 = vmul.f32 0.0078125, %v1337_v1 }
 0x4cb   :  { %v1342_v61 = vadd.f32 1e-05, %v1340_v23  ;;  %v1608_v23 = vsub.s32 5, %v2561_v38 }
 0x4cc   :  { %v1339_v42 = vpop.xlane.xlu1 %1338 }
 0x4cd   :  { %2177 = vrsqrt.f32 %v1342_v61  ;;  %v1341_v11 = vmul.f32 0.0078125, %v1339_v42  ;;  %v1614_v61 = vsub.s32 6, %v2561_v38  ;;  %v1609_v42 = vrot.slane %v2860_v57, %v1608_v23 }
 0x4cf   :  { %v1343_v31 = vadd.f32 1e-05, %v1341_v11 }
 0x4d1   :  { %2179 = vrsqrt.f32 %v1343_v31  ;;  %v1615_v31 = vrot.slane %v2860_v57, %v1614_v61 }
 0x4d7   :  { %v2178_v63 = vpop.eup %2177 }
 0x4d8   :  { %v1346_v39 = vmul.f32 %v2178_v63, %v1332_v26 }
 0x4da   :  { %v1352_v0 = vmul.f32 %v1351_v36, %v1346_v39 }
 0x4db   :  { %v2180_v47 = vpop.eup %2179 }
 0x4dc   :  { %v1347_v4 = vmul.f32 %v2180_v47, %v1333_v53  ;;  %v1358_v43 = vadd.f32 %v1357_v13, %v1352_v0 }
 0x4de   :  { %v1353_v37 = vmul.f32 %v1351_v36, %v1347_v4 }
 0x4e0   :  { %v1359_v32 = vadd.f32 %v1357_v13, %v1353_v37 }
 0x4e2   :  { %v1360_v49 = vpack.c.bf16 %v1359_v32, %v1358_v43 }
 0x4e4   :  { %1980 = vmatmul.mubr.bf16.vlgmr.msra.gmra.mrb[20].mxu0 %v1360_v49 }
 0x4e5   :  { %2019 = vmatprep.mubr.msk.bf16.mxu0 %vm2388_vm0, %v2387_v28  ;;  %2004 = vmatpush3.bf16.msra.mxu0 %v2105_v21 }
 0x4e6   :  { %2005 = vmatprep.subr.bf16.mxu0 %v2387_v28 }
 0x4e9   :  { %2006 = vmatpush3.bf16.msra.mxu0 %v2106_v60 }
 0x4ea   :  { %2007 = vmatprep.subr.bf16.mxu0 %v2387_v28 }
 0x4ed   :  { %2008 = vmatpush3.bf16.msra.mxu0 %v2107_v54 }
 0x4ee   :  { %2009 = vmatprep.subr.bf16.mxu0 %v2387_v28 }
 0x4f1   :  { %2010 = vmatpush3.bf16.msra.mxu0 %v2108_v14 }
 0x4f2   :  { %2011 = vmatprep.subr.bf16.mxu0 %v2387_v28 }
 0x4f5   :  { %2012 = vmatpush3.bf16.msra.mxu0 %v2109_v33 }
 0x4f6   :  { %2013 = vmatprep.subr.bf16.mxu0 %v2387_v28 }
 0x4f9   :  { %2014 = vmatpush3.bf16.msra.mxu0 %v2110_v58 }
 0x4fa   :  { %2015 = vmatprep.subr.bf16.mxu0 %v2387_v28 }
 0x4fd   :  { %2016 = vmatpush3.bf16.msra.mxu0 %v2111_v20 }
 0x4fe   :  { %2017 = vmatprep.subr.bf16.mxu0 %v2387_v28 }
 0x501   :  { %2018 = vmatpush3.bf16.msra.mxu0 %v2112_v56 }
 0x5b7   :  { %v1463_v52 = vpop.f32.mrb[20].mxu0 }
 0x5b8   :  { %v1464_v7 = vadd.f32 %v1463_v52, %v1380_v24  ;;  %v1981_v2 = vpop.f32.mrb[21].mxu0 }
 0x5b9   :  { %v1466_v46 = vpop.f32.mrb[22].mxu0 }
 0x5ba   :  { %v1467_v30 = vadd.f32 %v1466_v46, %v1380_v24  ;;  %v1982_v12 = vpop.f32.mrb[23].mxu0  ;;  %v1470_v8 = vmax.f32 %v1464_v7, 0.0 }
 0x5bc   :  { %v1471_v15 = vmax.f32 %v1467_v30, 0.0 }
 0x5be   :  { %v1472_v9 = vpack.c.bf16 %v1471_v15, %v1470_v8 }
 0x5c0   :  { %2000 = vmatmul.mubr.bf16.vlgmr.msra.gmra.mrb[8].mxu1 %v1472_v9 }
 0x693   :  { %v1575_v35 = vpop.f32.mrb[8].mxu1 }
 0x694   :  { %v1576_v22 = vadd.f32 %v1575_v35, %v1492_v16  ;;  %v2001_v48 = vpop.f32.mrb[9].mxu1 }
 0x695   :  { %v1578_v18 = vpop.f32.mrb[10].mxu1 }
 0x696   :  { %v1579_v50 = vadd.f32 %v1578_v18, %v1492_v16  ;;  %v2002_v10 = vpop.f32.mrb[11].mxu1  ;;  %v1582_v19 = vadd.f32 %v1576_v22, %v1358_v43  ;;  %v1651_v16 = vrot.slane %v2860_v57, %v1650_v34 }
 0x698   :  { %1584 = vadd.xlane.f32.xlu0 %v1582_v19  ;;  %v1583_v3 = vadd.f32 %v1579_v50, %v1359_v32 }
 0x69a   :  { %1586 = vadd.xlane.f32.xlu1 %v1583_v3 }
 0x725   :  { %v1585_v25 = vpop.xlane.xlu0 %1584 }
 0x726   :  { %v1588_v41 = vmul.f32 0.0078125, %v1585_v25 }
 0x727   :  { %v1587_v27 = vpop.xlane.xlu1 %1586 }
 0x728   :  { %v1590_v26 = vsub.f32 %v1582_v19, %v1588_v41  ;;  %v1589_v17 = vmul.f32 0.0078125, %v1587_v27 }
 0x72a   :  { %v1591_v29 = vsub.f32 %v1583_v3, %v1589_v17  ;;  %v1592_v51 = vmul.f32 %v1590_v26, %v1590_v26 }
 0x72c   :  { %1594 = vadd.xlane.f32.xlu0 %v1592_v51  ;;  %v1593_v53 = vmul.f32 %v1591_v29, %v1591_v29 }
 0x72e   :  { %1596 = vadd.xlane.f32.xlu1 %v1593_v53 }
 0x7b9   :  { %v1595_v44 = vpop.xlane.xlu0 %1594 }
 0x7ba   :  { %v1598_v6 = vmul.f32 0.0078125, %v1595_v44 }
 0x7bb   :  { %v1597_v5 = vpop.xlane.xlu1 %1596 }
 0x7bc   :  { %v1600_v55 = vadd.f32 1e-05, %v1598_v6  ;;  %v1599_v59 = vmul.f32 0.0078125, %v1597_v5 }
 0x7be   :  { %2181 = vrsqrt.f32 %v1600_v55  ;;  %v1601_v1 = vadd.f32 1e-05, %v1599_v59 }
 0x7c0   :  { %2183 = vrsqrt.f32 %v1601_v1 }
 0x7c8   :  { %v2182_v11 = vpop.eup %2181 }
 0x7c9   :  { %v1604_v36 = vmul.f32 %v2182_v11, %v1590_v26 }
 0x7ca   :  { %v2184_v28 = vpop.eup %2183 }
 0x7cb   :  { %v1610_v63 = vmul.f32 %v1609_v42, %v1604_v36  ;;  %v1605_v13 = vmul.f32 %v2184_v28, %v1591_v29 }
 0x7cd   :  { %v1616_v39 = vadd.f32 %v1615_v31, %v1610_v63  ;;  %v1611_v0 = vmul.f32 %v1609_v42, %v1605_v13 }
 0x7cf   :  { %v1618_v47 = vrot.slane %v1616_v39, 4  ;;  %v1617_v4 = vadd.f32 %v1615_v31, %v1611_v0 }
 0x7d1   :  { %v1624_v43 = vrot.slane %v1617_v4, 4  ;;  %v1619_v37 = vadd.f32 %v1618_v47, %v1616_v39 }
 0x7d3   :  { %v1620_v32 = vrot.slane %v1619_v37, 2  ;;  %v1625_v49 = vadd.f32 %v1624_v43, %v1617_v4 }
 0x7d5   :  { %v1621_v62 = vadd.f32 %v1620_v32, %v1619_v37  ;;  %v1626_v45 = vrot.slane %v1625_v49, 2 }
 0x7d7   :  { %v1622_v40 = vrot.slane %v1621_v62, 1  ;;  %v1627_v24 = vadd.f32 %v1626_v45, %v1625_v49 }
 0x7d9   :  { %v1623_v52 = vadd.f32 %v1622_v40, %v1621_v62  ;;  %v1628_v7 = vrot.slane %v1627_v24, 1 }
 0x7db   :  { %v1629_v2 = vadd.f32 %v1628_v7, %v1627_v24  ;;  %v1630_v46 = vpack.c.bf16 %v1623_v52, %v1623_v52 }
 0x7dd   :  { %v1631_v30 = vpack.c.bf16 %v1629_v2, %v1629_v2  ;;  %v1654_v12 = vunpack.c.l.b16 %v1630_v46 }
 0x7df   :  { %v1655_v8 = vunpack.c.l.b16 %v1631_v30 }
 0x7e1   :  { %v1656_v15 = vsel %vm1211_vm1, %v1655_v8, %v1654_v12 }
 0x7e2   :  { %v1657_v9 = vpack.c.b16 %v1656_v15, %v1656_v15 }
 0x7e4   :  { %2020 = vmatmul.mubr.bf16.vlgmr.msra.gmra.mrb[24].mxu0 %v1657_v9 }
 0x8b7   :  { %v1741_v35 = vpop.f32.mrb[24].mxu0 }
 0x8b8   :  { %v1742_v22 = vadd.f32 %v1741_v35, %v1651_v16  ;;  %v2021_v48 = vpop.f32.mrb[25].mxu0 }
 0x8b9   :  { %v1744_v18 = vpop.f32.mrb[26].mxu0 }
 0x8ba   :  { %1747 = vst [vmem:[#allocation14] sm:$0x3] %v1742_v22  ;;  %v2022_v50 = vpop.f32.mrb[27].mxu0 }
 0x8bb   :  { %2352 = shalt.err (!%p2349_p4)
}
 0x8bc   :  { %s2353_s13 = scalar_lea.hbm %s2926_s9, 32 }
 0x8bd   :  { %p2354_p5 = scmp.ne.s32.totalorder %s2926_s9, %s2353_s13  ;;  %p2357_p6 = scmp.lt.u32.totalorder %s2353_s13, %s2926_s9 }
 0x8bf   :  { %p2359_p7 = pnand %p2357_p6, %p2354_p5 }
 0x8c1   :  { %2362 = shalt.err (!%p2359_p7)
}
 0x8c2   :  { %1757 = dma.vmem_to_hbm [thread:$0]  %s1755_s0, 32, %s2926_s9, [#allocation4]  }
 0x8c3   :  { %2371 = dma.done.wait [#allocation4], 32  }
 0x8c4   :  { %2372 = vsyncadd [#allocation4], 4294967264 }
 0x8c5   :  { %1761 = vsyncpa [#allocation3], 1 }
 0x8c6   :  { %1762 = vsyncpa [#allocation6], 1 }
 0x8c7   :  { %1763 = vsyncpa [#allocation9], 1 }
 0x8c8   :  { %1764 = vsyncpa [#allocation12], 1 }
 0x8c9   :  { %1765 = vsyncpa [#allocation4], 1 }

</bundles_post_ra>
